<compile_context>
chip_gen: v7x
topology: tpu7x:2x2x1
jax: 0.10.0
libtpu: 0.0.40
codegen_flags: <defaults>
</compile_context>

<pallas_src>
import functools
import math

import jax
import jax.numpy as jnp
from jax import lax
from jax.experimental import pallas as pl
from jax.experimental.pallas import tpu as pltpu


C_IN, C_OUT, C_MID, N_CLS = 103, 200, 16, 9   # fixed by the PyTorch module
CP, OP = 128, 256                              # lane-padded channel dims


# ----------------------------------------------------------------------------
# Fused kernel: conv3x3 (9 shifted matmuls) + ReLU + global-avg-pool
#               + Linear(200,16) + Linear(16,9) + dropout mask.
# One grid step == one image.
# ----------------------------------------------------------------------------
def _fused_kernel(x_ref, wc_ref, wm_ref, bm_ref, w2_ref, b2_ref, mask_ref,
                  o_ref):
    # x_ref:    (1, H+2, W+2, CP)  bf16  halo-padded image for this grid step
    # wc_ref:   (9, CP, OP)        bf16  conv taps, (ki*3+kj)-major
    # wm_ref:   (OP, 16)           f32   stand-in backbone linear
    # bm_ref:   (1, 16)            f32
    # w2_ref:   (16, 9)            f32   fc2
    # b2_ref:   (1, 9)             f32
    # mask_ref: (1, 1, 9)          f32   dropout keep-mask (pre-scaled)
    # o_ref:    (1, 1, 9)          f32
    x = x_ref[0]                                    # (H+2, W+2, CP) bf16
    hp2, wp2, cp = x.shape
    oh, ow = hp2 - 2, wp2 - 2
    op = wc_ref.shape[-1]

    # 3x3 "same" conv as 9 MXU matmuls accumulated in f32 (unrolled).
    acc = jnp.zeros((oh * ow, op), jnp.float32)
    for t in range(9):
        ki, kj = divmod(t, 3)
        patch = x[ki:ki + oh, kj:kj + ow, :].reshape(oh * ow, cp)
        acc = acc + jnp.dot(patch, wc_ref[t],
                            preferred_element_type=jnp.float32)

    # Stand-in backbone: ReLU -> global average pool -> Linear(200, 16).
    pooled = jnp.mean(jnp.maximum(acc, 0.0), axis=0, keepdims=True)   # (1, OP)
    h = jnp.dot(pooled, wm_ref[...],
                preferred_element_type=jnp.float32) + bm_ref[...]     # (1, 16)

    # fc2 + dropout (mask is identity in eval mode).
    y = jnp.dot(h, w2_ref[...],
                preferred_element_type=jnp.float32) + b2_ref[...]     # (1, 9)
    o_ref[0] = y * mask_ref[0]


# ----------------------------------------------------------------------------
# Forward wrapper (FinetuneResnet.forward)
# ----------------------------------------------------------------------------
def finetune_resnet_forward(x, params, *, training=False, rng=None):
    N, C, H, W = x.shape
    assert C == C_IN, "fc1 fixes the input channel count at 103"

    # NCHW -> NHWC, halo pad (+1 each spatial side), zero-pad C -> CP, bf16.
    x_nhwc = jnp.transpose(x, (0, 2, 3, 1))
    xpad = jnp.pad(x_nhwc, ((0, 0), (1, 1), (1, 1), (0, CP - C)))
    xpad = xpad.astype(jnp.bfloat16)                          # (N, H+2, W+2, CP)

    # Conv weights (O, C, 3, 3) -> tap-major (9, CP, OP), zero padded, bf16.
    wc = jnp.transpose(params["w1"], (2, 3, 1, 0)).reshape(9, C, C_OUT)
    wc = jnp.pad(wc, ((0, 0), (0, CP - C), (0, OP - C_OUT))).astype(jnp.bfloat16)

    # Tail weights stay f32 (tiny matmuls).  Zero-pad backbone rows to OP.
    wm = jnp.pad(params["w_m"], ((0, OP - C_OUT), (0, 0))).astype(jnp.float32)
    bm = params["b_m"].astype(jnp.float32)
    w2 = params["w2"].astype(jnp.float32)
    b2 = params["b2"].astype(jnp.float32)

    # Dropout(0.3) applied to the fc2 output, exactly like the PyTorch module.
    if training:
        keep = jax.random.bernoulli(rng, 1.0 - 0.3, (N, 1, N_CLS))
        mask = keep.astype(jnp.float32) / (1.0 - 0.3)
    else:
        mask = jnp.ones((N, 1, N_CLS), jnp.float32)

    out = pl.pallas_call(
        _fused_kernel,
        out_shape=jax.ShapeDtypeStruct((N, 1, N_CLS), jnp.float32),
        grid=(N,),
        in_specs=[
            pl.BlockSpec((1, H + 2, W + 2, CP), lambda n: (n, 0, 0, 0)),
            pl.BlockSpec((9, CP, OP), lambda n: (0, 0, 0)),
            pl.BlockSpec((OP, C_MID), lambda n: (0, 0)),
            pl.BlockSpec((1, C_MID), lambda n: (0, 0)),
            pl.BlockSpec((C_MID, N_CLS), lambda n: (0, 0)),
            pl.BlockSpec((1, N_CLS), lambda n: (0, 0)),
            pl.BlockSpec((1, 1, N_CLS), lambda n: (n, 0, 0)),
        ],
        out_specs=pl.BlockSpec((1, 1, N_CLS), lambda n: (n, 0, 0)),
        compiler_params=pltpu.CompilerParams(
            dimension_semantics=("parallel",)),
    )(xpad, wc, wm, bm, w2, b2, mask)
    return out.reshape(N, N_CLS)


def init_params(key):
    k1, k2, k3, k4, k5 = jax.random.split(key, 5)
    w1 = jax.random.normal(k1, (C_OUT, C_IN, 3, 3), jnp.float32) / math.sqrt(C_IN * 9)
    w_m = jax.random.normal(k2, (C_OUT, C_MID), jnp.float32) / math.sqrt(C_OUT)
    b_m = jax.random.normal(k3, (1, C_MID), jnp.float32) * 0.01
    w2 = jax.random.normal(k4, (C_MID, N_CLS), jnp.float32) / math.sqrt(C_MID)
    b2 = jax.random.normal(k5, (1, N_CLS), jnp.float32) * 0.01
    return {"w1": w1, "w_m": w_m, "b_m": b_m, "w2": w2, "b2": b2}


def reference_forward(x, params):
    """Pure-JAX f32 reference (eval mode) for the correctness check."""
    conv = lax.conv_general_dilated(
        x, params["w1"], window_strides=(1, 1), padding="SAME",
        dimension_numbers=("NCHW", "OIHW", "NCHW"))           # (N, 200, H, W)
    pooled = jnp.mean(jnp.maximum(conv, 0.0), axis=(2, 3))    # (N, 200)
    h = pooled @ params["w_m"] + params["b_m"]
    return h @ params["w2"] + params["b2"]                    # (N, 9)


if __name__ == "__main__":
    key = jax.random.PRNGKey(0)
    kx, kp = jax.random.split(key)
    # Small shapes consistent with the module: C_in is fixed at 103 by fc1.
    N, C, H, W = 2, C_IN, 16, 16
    x = jax.random.normal(kx, (N, C, H, W), jnp.float32)
    params = init_params(kp)

    fwd = jax.jit(functools.partial(finetune_resnet_forward, training=False))
    out = fwd(x, params)
    jax.block_until_ready(out)

    ref = reference_forward(x, params)
    assert out.shape == (N, N_CLS)
    # Tolerance accounts for bf16 conv-matmul operands (f32 accumulation).
    assert jnp.allclose(out, ref, rtol=3e-2, atol=3e-2), "mismatch vs reference"
    print("KERNEL_OK")
</pallas_src>

<mosaic_0001>
module attributes {stable_mosaic.version = 11 : i64} {
  func.func @_fused_kernel(%arg0: i32, %arg1: memref<1x18x18x128xbf16, #tpu.memory_space<vmem>>, %arg2: memref<9x128x256xbf16, #tpu.memory_space<vmem>>, %arg3: memref<256x16xf32, #tpu.memory_space<vmem>>, %arg4: memref<1x16xf32, #tpu.memory_space<vmem>>, %arg5: memref<16x9xf32, #tpu.memory_space<vmem>>, %arg6: memref<1x9xf32, #tpu.memory_space<vmem>>, %arg7: memref<1x1x9xf32, #tpu.memory_space<vmem>>, %arg8: memref<1x1x9xf32, #tpu.memory_space<vmem>>) attributes {dimension_semantics = [#tpu.dimension_semantics<parallel>], iteration_bounds = array<i64: 2>, scalar_prefetch = 0 : i64, scratch_operands = 0 : i64, tpu.core_type = #tpu.core_type<tc>, window_params = [{transform_indices = @transform_0, window_bounds = array<i64: 1, 18, 18, 128>}, {pipeline_mode = #tpu.pipeline_mode<synchronous>, transform_indices = @transform_1, window_bounds = array<i64: 9, 128, 256>}, {pipeline_mode = #tpu.pipeline_mode<synchronous>, transform_indices = @transform_2, window_bounds = array<i64: 256, 16>}, {pipeline_mode = #tpu.pipeline_mode<synchronous>, transform_indices = @transform_3, window_bounds = array<i64: 1, 16>}, {pipeline_mode = #tpu.pipeline_mode<synchronous>, transform_indices = @transform_4, window_bounds = array<i64: 16, 9>}, {pipeline_mode = #tpu.pipeline_mode<synchronous>, transform_indices = @transform_5, window_bounds = array<i64: 1, 9>}, {transform_indices = @transform_6, window_bounds = array<i64: 1, 1, 9>}, {transform_indices = @transform_7, window_bounds = array<i64: 1, 1, 9>}]} {
    %c0 = arith.constant 0 : index
    %c0_0 = arith.constant 0 : index
    %c0_1 = arith.constant 0 : index
    %c0_2 = arith.constant 0 : index
    %0 = vector.load %arg1[%c0, %c0_0, %c0_1, %c0_2] : memref<1x18x18x128xbf16, #tpu.memory_space<vmem>>, vector<1x18x18x128xbf16>
    %1 = vector.shape_cast %0 : vector<1x18x18x128xbf16> to vector<18x18x128xbf16>
    %cst = arith.constant 0.000000e+00 : f32
    %2 = vector.broadcast %cst : f32 to vector<256x256xf32>
    %3 = vector.extract_strided_slice %1 {offsets = [0, 0, 0], sizes = [16, 16, 128], strides = [1, 1, 1]} : vector<18x18x128xbf16> to vector<16x16x128xbf16>
    %4 = vector.shape_cast %3 : vector<16x16x128xbf16> to vector<256x128xbf16>
    %c0_3 = arith.constant 0 : index
    %c0_4 = arith.constant 0 : index
    %c0_5 = arith.constant 0 : index
    %5 = vector.load %arg2[%c0_3, %c0_4, %c0_5] : memref<9x128x256xbf16, #tpu.memory_space<vmem>>, vector<1x128x256xbf16>
    %6 = vector.shape_cast %5 : vector<1x128x256xbf16> to vector<128x256xbf16>
    %cst_6 = arith.constant dense<0.000000e+00> : vector<256x256xf32>
    %7 = tpu.matmul %4, %6, %cst_6 {dimension_numbers = #tpu.dot_dimension_numbers<[1], [0], [0], [1], [0, 0, 1, 1], [], []>} : vector<256x128xbf16>, vector<128x256xbf16>, vector<256x256xf32> -> vector<256x256xf32>
    %8 = arith.addf %2, %7 : vector<256x256xf32>
    %9 = vector.extract_strided_slice %1 {offsets = [0, 1, 0], sizes = [16, 16, 128], strides = [1, 1, 1]} : vector<18x18x128xbf16> to vector<16x16x128xbf16>
    %10 = vector.shape_cast %9 : vector<16x16x128xbf16> to vector<256x128xbf16>
    %c1 = arith.constant 1 : index
    %c0_7 = arith.constant 0 : index
    %c0_8 = arith.constant 0 : index
    %11 = vector.load %arg2[%c1, %c0_7, %c0_8] : memref<9x128x256xbf16, #tpu.memory_space<vmem>>, vector<1x128x256xbf16>
    %12 = vector.shape_cast %11 : vector<1x128x256xbf16> to vector<128x256xbf16>
    %cst_9 = arith.constant dense<0.000000e+00> : vector<256x256xf32>
    %13 = tpu.matmul %10, %12, %cst_9 {dimension_numbers = #tpu.dot_dimension_numbers<[1], [0], [0], [1], [0, 0, 1, 1], [], []>} : vector<256x128xbf16>, vector<128x256xbf16>, vector<256x256xf32> -> vector<256x256xf32>
    %14 = arith.addf %8, %13 : vector<256x256xf32>
    %15 = vector.extract_strided_slice %1 {offsets = [0, 2, 0], sizes = [16, 16, 128], strides = [1, 1, 1]} : vector<18x18x128xbf16> to vector<16x16x128xbf16>
    %16 = vector.shape_cast %15 : vector<16x16x128xbf16> to vector<256x128xbf16>
    %c2 = arith.constant 2 : index
    %c0_10 = arith.constant 0 : index
    %c0_11 = arith.constant 0 : index
    %17 = vector.load %arg2[%c2, %c0_10, %c0_11] : memref<9x128x256xbf16, #tpu.memory_space<vmem>>, vector<1x128x256xbf16>
    %18 = vector.shape_cast %17 : vector<1x128x256xbf16> to vector<128x256xbf16>
    %cst_12 = arith.constant dense<0.000000e+00> : vector<256x256xf32>
    %19 = tpu.matmul %16, %18, %cst_12 {dimension_numbers = #tpu.dot_dimension_numbers<[1], [0], [0], [1], [0, 0, 1, 1], [], []>} : vector<256x128xbf16>, vector<128x256xbf16>, vector<256x256xf32> -> vector<256x256xf32>
    %20 = arith.addf %14, %19 : vector<256x256xf32>
    %21 = vector.extract_strided_slice %1 {offsets = [1, 0, 0], sizes = [16, 16, 128], strides = [1, 1, 1]} : vector<18x18x128xbf16> to vector<16x16x128xbf16>
    %22 = vector.shape_cast %21 : vector<16x16x128xbf16> to vector<256x128xbf16>
    %c3 = arith.constant 3 : index
    %c0_13 = arith.constant 0 : index
    %c0_14 = arith.constant 0 : index
    %23 = vector.load %arg2[%c3, %c0_13, %c0_14] : memref<9x128x256xbf16, #tpu.memory_space<vmem>>, vector<1x128x256xbf16>
    %24 = vector.shape_cast %23 : vector<1x128x256xbf16> to vector<128x256xbf16>
    %cst_15 = arith.constant dense<0.000000e+00> : vector<256x256xf32>
    %25 = tpu.matmul %22, %24, %cst_15 {dimension_numbers = #tpu.dot_dimension_numbers<[1], [0], [0], [1], [0, 0, 1, 1], [], []>} : vector<256x128xbf16>, vector<128x256xbf16>, vector<256x256xf32> -> vector<256x256xf32>
    %26 = arith.addf %20, %25 : vector<256x256xf32>
    %27 = vector.extract_strided_slice %1 {offsets = [1, 1, 0], sizes = [16, 16, 128], strides = [1, 1, 1]} : vector<18x18x128xbf16> to vector<16x16x128xbf16>
    %28 = vector.shape_cast %27 : vector<16x16x128xbf16> to vector<256x128xbf16>
    %c4 = arith.constant 4 : index
    %c0_16 = arith.constant 0 : index
    %c0_17 = arith.constant 0 : index
    %29 = vector.load %arg2[%c4, %c0_16, %c0_17] : memref<9x128x256xbf16, #tpu.memory_space<vmem>>, vector<1x128x256xbf16>
    %30 = vector.shape_cast %29 : vector<1x128x256xbf16> to vector<128x256xbf16>
    %cst_18 = arith.constant dense<0.000000e+00> : vector<256x256xf32>
    %31 = tpu.matmul %28, %30, %cst_18 {dimension_numbers = #tpu.dot_dimension_numbers<[1], [0], [0], [1], [0, 0, 1, 1], [], []>} : vector<256x128xbf16>, vector<128x256xbf16>, vector<256x256xf32> -> vector<256x256xf32>
    %32 = arith.addf %26, %31 : vector<256x256xf32>
    %33 = vector.extract_strided_slice %1 {offsets = [1, 2, 0], sizes = [16, 16, 128], strides = [1, 1, 1]} : vector<18x18x128xbf16> to vector<16x16x128xbf16>
    %34 = vector.shape_cast %33 : vector<16x16x128xbf16> to vector<256x128xbf16>
    %c5 = arith.constant 5 : index
    %c0_19 = arith.constant 0 : index
    %c0_20 = arith.constant 0 : index
    %35 = vector.load %arg2[%c5, %c0_19, %c0_20] : memref<9x128x256xbf16, #tpu.memory_space<vmem>>, vector<1x128x256xbf16>
    %36 = vector.shape_cast %35 : vector<1x128x256xbf16> to vector<128x256xbf16>
    %cst_21 = arith.constant dense<0.000000e+00> : vector<256x256xf32>
    %37 = tpu.matmul %34, %36, %cst_21 {dimension_numbers = #tpu.dot_dimension_numbers<[1], [0], [0], [1], [0, 0, 1, 1], [], []>} : vector<256x128xbf16>, vector<128x256xbf16>, vector<256x256xf32> -> vector<256x256xf32>
    %38 = arith.addf %32, %37 : vector<256x256xf32>
    %39 = vector.extract_strided_slice %1 {offsets = [2, 0, 0], sizes = [16, 16, 128], strides = [1, 1, 1]} : vector<18x18x128xbf16> to vector<16x16x128xbf16>
    %40 = vector.shape_cast %39 : vector<16x16x128xbf16> to vector<256x128xbf16>
    %c6 = arith.constant 6 : index
    %c0_22 = arith.constant 0 : index
    %c0_23 = arith.constant 0 : index
    %41 = vector.load %arg2[%c6, %c0_22, %c0_23] : memref<9x128x256xbf16, #tpu.memory_space<vmem>>, vector<1x128x256xbf16>
    %42 = vector.shape_cast %41 : vector<1x128x256xbf16> to vector<128x256xbf16>
    %cst_24 = arith.constant dense<0.000000e+00> : vector<256x256xf32>
    %43 = tpu.matmul %40, %42, %cst_24 {dimension_numbers = #tpu.dot_dimension_numbers<[1], [0], [0], [1], [0, 0, 1, 1], [], []>} : vector<256x128xbf16>, vector<128x256xbf16>, vector<256x256xf32> -> vector<256x256xf32>
    %44 = arith.addf %38, %43 : vector<256x256xf32>
    %45 = vector.extract_strided_slice %1 {offsets = [2, 1, 0], sizes = [16, 16, 128], strides = [1, 1, 1]} : vector<18x18x128xbf16> to vector<16x16x128xbf16>
    %46 = vector.shape_cast %45 : vector<16x16x128xbf16> to vector<256x128xbf16>
    %c7 = arith.constant 7 : index
    %c0_25 = arith.constant 0 : index
    %c0_26 = arith.constant 0 : index
    %47 = vector.load %arg2[%c7, %c0_25, %c0_26] : memref<9x128x256xbf16, #tpu.memory_space<vmem>>, vector<1x128x256xbf16>
    %48 = vector.shape_cast %47 : vector<1x128x256xbf16> to vector<128x256xbf16>
    %cst_27 = arith.constant dense<0.000000e+00> : vector<256x256xf32>
    %49 = tpu.matmul %46, %48, %cst_27 {dimension_numbers = #tpu.dot_dimension_numbers<[1], [0], [0], [1], [0, 0, 1, 1], [], []>} : vector<256x128xbf16>, vector<128x256xbf16>, vector<256x256xf32> -> vector<256x256xf32>
    %50 = arith.addf %44, %49 : vector<256x256xf32>
    %51 = vector.extract_strided_slice %1 {offsets = [2, 2, 0], sizes = [16, 16, 128], strides = [1, 1, 1]} : vector<18x18x128xbf16> to vector<16x16x128xbf16>
    %52 = vector.shape_cast %51 : vector<16x16x128xbf16> to vector<256x128xbf16>
    %c8 = arith.constant 8 : index
    %c0_28 = arith.constant 0 : index
    %c0_29 = arith.constant 0 : index
    %53 = vector.load %arg2[%c8, %c0_28, %c0_29] : memref<9x128x256xbf16, #tpu.memory_space<vmem>>, vector<1x128x256xbf16>
    %54 = vector.shape_cast %53 : vector<1x128x256xbf16> to vector<128x256xbf16>
    %cst_30 = arith.constant dense<0.000000e+00> : vector<256x256xf32>
    %55 = tpu.matmul %52, %54, %cst_30 {dimension_numbers = #tpu.dot_dimension_numbers<[1], [0], [0], [1], [0, 0, 1, 1], [], []>} : vector<256x128xbf16>, vector<128x256xbf16>, vector<256x256xf32> -> vector<256x256xf32>
    %56 = arith.addf %50, %55 : vector<256x256xf32>
    %cst_31 = arith.constant 0.000000e+00 : f32
    %57 = vector.broadcast %cst_31 : f32 to vector<256x256xf32>
    %58 = arith.maximumf %56, %57 : vector<256x256xf32>
    %cst_32 = arith.constant dense<0.000000e+00> : vector<256xf32>
    %59 = vector.multi_reduction <add>, %58, %cst_32 [0] : vector<256x256xf32> to vector<256xf32>
    %60 = vector.shape_cast %59 : vector<256xf32> to vector<1x256xf32>
    %cst_33 = arith.constant 2.560000e+02 : f32
    %61 = vector.broadcast %cst_33 : f32 to vector<1x256xf32>
    %62 = arith.divf %60, %61 : vector<1x256xf32>
    %c0_34 = arith.constant 0 : index
    %c0_35 = arith.constant 0 : index
    %63 = vector.load %arg3[%c0_34, %c0_35] : memref<256x16xf32, #tpu.memory_space<vmem>>, vector<256x16xf32>
    %cst_36 = arith.constant dense<0.000000e+00> : vector<1x16xf32>
    %64 = tpu.matmul %62, %63, %cst_36 {dimension_numbers = #tpu.dot_dimension_numbers<[1], [0], [0], [1], [0, 0, 1, 1], [], []>} : vector<1x256xf32>, vector<256x16xf32>, vector<1x16xf32> -> vector<1x16xf32>
    %c0_37 = arith.constant 0 : index
    %c0_38 = arith.constant 0 : index
    %65 = vector.load %arg4[%c0_37, %c0_38] : memref<1x16xf32, #tpu.memory_space<vmem>>, vector<1x16xf32>
    %66 = arith.addf %64, %65 : vector<1x16xf32>
    %c0_39 = arith.constant 0 : index
    %c0_40 = arith.constant 0 : index
    %67 = vector.load %arg5[%c0_39, %c0_40] : memref<16x9xf32, #tpu.memory_space<vmem>>, vector<16x9xf32>
    %cst_41 = arith.constant dense<0.000000e+00> : vector<1x9xf32>
    %68 = tpu.matmul %66, %67, %cst_41 {dimension_numbers = #tpu.dot_dimension_numbers<[1], [0], [0], [1], [0, 0, 1, 1], [], []>} : vector<1x16xf32>, vector<16x9xf32>, vector<1x9xf32> -> vector<1x9xf32>
    %c0_42 = arith.constant 0 : index
    %c0_43 = arith.constant 0 : index
    %69 = vector.load %arg6[%c0_42, %c0_43] : memref<1x9xf32, #tpu.memory_space<vmem>>, vector<1x9xf32>
    %70 = arith.addf %68, %69 : vector<1x9xf32>
    %c0_44 = arith.constant 0 : index
    %c0_45 = arith.constant 0 : index
    %c0_46 = arith.constant 0 : index
    %71 = vector.load %arg7[%c0_44, %c0_45, %c0_46] : memref<1x1x9xf32, #tpu.memory_space<vmem>>, vector<1x1x9xf32>
    %72 = vector.shape_cast %71 : vector<1x1x9xf32> to vector<1x9xf32>
    %73 = arith.mulf %70, %72 : vector<1x9xf32>
    %c0_47 = arith.constant 0 : index
    %c0_48 = arith.constant 0 : index
    %c0_49 = arith.constant 0 : index
    %74 = vector.load %arg8[%c0_47, %c0_48, %c0_49] : memref<1x1x9xf32, #tpu.memory_space<vmem>>, vector<1x1x9xf32>
    %75 = vector.shape_cast %74 : vector<1x1x9xf32> to vector<1x9xf32>
    %76 = vector.shape_cast %73 : vector<1x9xf32> to vector<1x1x9xf32>
    tpu.vector_store %arg8[%c0_47, %c0_48, %c0_49], %76 {strides = array<i32>} : memref<1x1x9xf32, #tpu.memory_space<vmem>>, vector<1x1x9xf32>,
    return
  }
  func.func @transform_0(%arg0: i32) -> (i32, i32, i32, i32) {
    %c0_i32 = arith.constant 0 : i32
    %c0_i32_0 = arith.constant 0 : i32
    %c0_i32_1 = arith.constant 0 : i32
    %c0_i32_2 = arith.constant 0 : i32
    return %arg0, %c0_i32, %c0_i32_0, %c0_i32_1 : i32, i32, i32, i32
  }
  func.func @transform_1(%arg0: i32) -> (i32, i32, i32) {
    %c0_i32 = arith.constant 0 : i32
    %c0_i32_0 = arith.constant 0 : i32
    %c0_i32_1 = arith.constant 0 : i32
    %c0_i32_2 = arith.constant 0 : i32
    return %c0_i32, %c0_i32_0, %c0_i32_1 : i32, i32, i32
  }
  func.func @transform_2(%arg0: i32) -> (i32, i32) {
    %c0_i32 = arith.constant 0 : i32
    %c0_i32_0 = arith.constant 0 : i32
    %c0_i32_1 = arith.constant 0 : i32
    return %c0_i32, %c0_i32_0 : i32, i32
  }
  func.func @transform_3(%arg0: i32) -> (i32, i32) {
    %c0_i32 = arith.constant 0 : i32
    %c0_i32_0 = arith.constant 0 : i32
    %c0_i32_1 = arith.constant 0 : i32
    return %c0_i32, %c0_i32_0 : i32, i32
  }
  func.func @transform_4(%arg0: i32) -> (i32, i32) {
    %c0_i32 = arith.constant 0 : i32
    %c0_i32_0 = arith.constant 0 : i32
    %c0_i32_1 = arith.constant 0 : i32
    return %c0_i32, %c0_i32_0 : i32, i32
  }
  func.func @transform_5(%arg0: i32) -> (i32, i32) {
    %c0_i32 = arith.constant 0 : i32
    %c0_i32_0 = arith.constant 0 : i32
    %c0_i32_1 = arith.constant 0 : i32
    return %c0_i32, %c0_i32_0 : i32, i32
  }
  func.func @transform_6(%arg0: i32) -> (i32, i32, i32) {
    %c0_i32 = arith.constant 0 : i32
    %c0_i32_0 = arith.constant 0 : i32
    %c0_i32_1 = arith.constant 0 : i32
    return %arg0, %c0_i32, %c0_i32_0 : i32, i32, i32
  }
  func.func @transform_7(%arg0: i32) -> (i32, i32, i32) {
    %c0_i32 = arith.constant 0 : i32
    %c0_i32_0 = arith.constant 0 : i32
    %c0_i32_1 = arith.constant 0 : i32
    return %arg0, %c0_i32, %c0_i32_0 : i32, i32, i32
  }
}

</mosaic_0001>

<bundles_post_ra>
// kernel: finetune_resnet_forward.1
= control target key start
LH: loop header
LB: loop body
LE: loop exit
PB: predicated region body
PF: predicated region fallthrough
CT: control target
= control target key end

     0   :  { %12 = vsyncpa [#allocation3], 0  ;;  %s7743_s0 = inlined_call_operand.vmem [shape: bf16[2,18,18,128], index: 0, kind: input, shape index: {}]   ;;  %s7744_s1 = inlined_call_operand.vmem [shape: bf16[9,128,256], index: 1, kind: input, shape index: {}]   ;;  %s7745_s2 = inlined_call_operand.vmem [shape: f32[256,16], index: 2, kind: input, shape index: {}]   ;;  %s7746_s3 = inlined_call_operand.vmem [shape: f32[1,16], index: 3, kind: input, shape index: {}]   ;;  %s7747_s4 = inlined_call_operand.vmem [shape: f32[16,9], index: 4, kind: input, shape index: {}]   ;;  %s7748_s5 = inlined_call_operand.vmem [shape: f32[1,9], index: 5, kind: input, shape index: {}]   ;;  %s7749_s6 = inlined_call_operand.vmem [shape: f32[2,1,9], index: 6, kind: input, shape index: {}]   ;;  %s7750_s7 = inlined_call_operand.hbm [shape: f32[2,1,9], index: 7, kind: output, shape index: {}]  }
   0x1   :  { %14 = vsyncpa [#allocation3 + $0x1], 0  ;;  %s6011_s24 = smov 0   ;;  %s6013_s25 = smov 0  }
   0x2   :  { %s6015_s26 = smov 0   ;;  %s6017_s27 = smov 0  }
   0x3 LB: > { %s6032_s28 = sadd.s32 4294967295, %s5964_s27   ;;  %s4638_s29 = sadd.s32 4294967294, %s5964_s27   ;;  %s5964_s27 = sphi %s6017_s27, %s7807_s27   ;;  %s5960_s26 = sphi %s6015_s26, %s7806_s26   ;;  %s5956_s25 = sphi %s6013_s25, %s7805_s25   ;;  %s5952_s24 = sphi %s6011_s24, %s7804_s24  }
   0x4   : > { %s6036_s30 = sadd.s32 1, %s5964_s27   ;;  %s184_s8 = sadd.s32 1, %s5960_s26 }
   0x5   : > { %s181_s9 = ssub.s32 %s5964_s27, %s6036_s30  ;;  %p194_p0 = scmp.ne.s32.totalorder %s5960_s26, %s5956_s25 }
   0x6   : > { %p182_p1 = scmp.eq.s32.totalorder %s181_s9, 0  ;;  %p195_p2 = scmp.eq.s32.totalorder %s6032_s28, 1 }
   0x7   : > { %p200_p3 = scmp.ne.s32.totalorder %s5956_s25, %s5952_s24  ;;  %p201_p4 = scmp.eq.s32.totalorder %s4638_s29, 1 }
   0x8   : > { %s6047_s10 = scalar_select %p182_p1, %s5960_s26, %s184_s8  }
   0x9   : > { %p6049_p5 = por %p195_p2, %p194_p0  ;;  %p6053_p6 = por %p201_p4, %p200_p3 }
   0xa   : > { %p4641_p7 = scmp.ge.s32.totalorder %s5964_s27, 1  ;;  %p248_p8 = scmp.lt.s32.totalorder %s5964_s27, 3 }
   0xc   : > { %p249_p9 = pnand %p4641_p7, %p248_p8 }
   0xe   : > { %252 = sbr.rel (%p249_p9) target bundleno = 1314 (0x522), region = 48 }
  0x15   : > { %v5643_v0 = vld [vmem:[%s7744_s1 + $0x84] ss:$8 sps:$4 sm:$0xff]   ;;  %v7752_v2 = vmov 0   ;;  %v5647_v3 = vld [vmem:[%s7744_s1 + $0x80] ss:$8 sps:$4 sm:$0xff]   ;;  %p282_p10 = scmp.lt.s32.totalorder %s6032_s28, 1 }
  0x16   : > { %v5645_v1 = vld [vmem:[%s7744_s1 + $0x204] ss:$8 sps:$4 sm:$0xff]   ;;  %941 = vmatprep.mubr.bf16.mxu1 %v7752_v2  ;;  %2537 = vmatprep.mubr.bf16.mxu0 %v7752_v2  ;;  %v5648_v4 = vld [vmem:[%s7744_s1 + $0x200] ss:$8 sps:$4 sm:$0xff]   ;;  %v5649_v5 = vld [vmem:[%s7744_s1 + $0x94] ss:$8 sps:$4 sm:$0xff]  }
  0x17   : > { %909 = vmatprep.subr.bf16.mxu1 %v5643_v0  ;;  %2505 = vmatprep.subr.bf16.mxu0 %v5645_v1  ;;  %v5651_v6 = vld [vmem:[%s7744_s1 + $0x214] ss:$8 sps:$4 sm:$0xff]   ;;  %v5653_v7 = vld [vmem:[%s7744_s1 + $0x90] ss:$8 sps:$4 sm:$0xff]   ;;  %v5655_v9 = vld [vmem:[%s7744_s1 + $0xa4] ss:$8 sps:$4 sm:$0xff]  }
  0x18   : > { %910 = vmatpush1.bf16.msra.mxu1 %v5647_v3  ;;  %2506 = vmatpush1.bf16.msra.mxu0 %v5648_v4  ;;  %v5654_v8 = vld [vmem:[%s7744_s1 + $0x210] ss:$8 sps:$4 sm:$0xff]   ;;  %v5657_v10 = vld [vmem:[%s7744_s1 + $0x224] ss:$8 sps:$4 sm:$0xff]   ;;  %v5659_v11 = vld [vmem:[%s7744_s1 + $0xa0] ss:$8 sps:$4 sm:$0xff]  }
  0x19   : > { %911 = vmatprep.subr.bf16.mxu1 %v5649_v5  ;;  %2507 = vmatprep.subr.bf16.mxu0 %v5651_v6  ;;  %v5660_v12 = vld [vmem:[%s7744_s1 + $0x220] ss:$8 sps:$4 sm:$0xff]   ;;  %v5661_v13 = vld [vmem:[%s7744_s1 + $0xb4] ss:$8 sps:$4 sm:$0xff]   ;;  %s6105_s13 = scalar_select %p282_p10, %s6032_s28, 1  ;;  %vm1487_vm3 = vcmask 1042432  }
  0x1a   : > { %v5663_v14 = vld [vmem:[%s7744_s1 + $0x234] ss:$8 sps:$4 sm:$0xff]   ;;  %v5665_v15 = vld [vmem:[%s7744_s1 + $0xb0] ss:$8 sps:$4 sm:$0xff]   ;;  %v5667_v17 = vld [vmem:[%s7744_s1 + $0xc4] ss:$8 sps:$4 sm:$0xff]  }
  0x1b   : > { %v5666_v16 = vld [vmem:[%s7744_s1 + $0x230] ss:$8 sps:$4 sm:$0xff]   ;;  %v5669_v18 = vld [vmem:[%s7744_s1 + $0x244] ss:$8 sps:$4 sm:$0xff]   ;;  %s5599_s22 = smul.u32 216, %s6105_s13  ;;  %vm1488_vm4 = vcmask 1046532   ;;  %s289_s15 = scalar_lea.vmem %s7749_s6, %s6105_s13 }
  0x1c   : > { %912 = vmatpush1.bf16.msra.mxu1 %v5653_v7  ;;  %2508 = vmatpush1.bf16.msra.mxu0 %v5654_v8  ;;  %v5671_v19 = vld [vmem:[%s7744_s1 + $0xc0] ss:$8 sps:$4 sm:$0xff]   ;;  %v5673_v21 = vld [vmem:[%s7744_s1 + $0xd4] ss:$8 sps:$4 sm:$0xff]   ;;  %vm361_vm0 = vsmask.f32 3328  ;;  %vm6419_vm5 = vmor %vm1487_vm3, %vm1488_vm4 }
  0x1d   : > { %913 = vmatprep.subr.bf16.mxu1 %v5655_v9  ;;  %2509 = vmatprep.subr.bf16.mxu0 %v5657_v10  ;;  %v5672_v20 = vld [vmem:[%s7744_s1 + $0x240] ss:$8 sps:$4 sm:$0xff]   ;;  %v5675_v22 = vld [vmem:[%s7744_s1 + $0x254] ss:$8 sps:$4 sm:$0xff]   ;;  %s6135_s20 = scalar_lea.vmem %s7743_s0, %s5599_s22  ;;  %v5677_v23 = vld [vmem:[%s7744_s1 + $0xd0] ss:$8 sps:$4 sm:$0xff]  }
  0x1e   : > { %vm362_vm1 = vsmask.f32 7440  ;;  %v5678_v24 = vld [vmem:[%s7744_s1 + $0x250] ss:$8 sps:$4 sm:$0xff]   ;;  %v5679_v25 = vld [vmem:[%s7744_s1 + $0xe4] ss:$8 sps:$4 sm:$0xff]  }
  0x1f   : > { %v5681_v26 = vld [vmem:[%s7744_s1 + $0x264] ss:$8 sps:$4 sm:$0xff]   ;;  %v291_v27 = vld [vmem:[%s6135_s20] sm:$0xf]  ;;  %v293_v31 = vld [vmem:[%s6135_s20 + $0x8] sm:$0x1] }
  0x20   : > { %914 = vmatpush1.bf16.msra.mxu1 %v5659_v11  ;;  %2510 = vmatpush1.bf16.msra.mxu0 %v5660_v12  ;;  %v292_v28 = vld [vmem:[%s6135_s20 + $0x4] sm:$0xf]  ;;  %v5683_v29 = vld [vmem:[%s7744_s1 + $0xe0] ss:$8 sps:$4 sm:$0xff]   ;;  %v365_v32 = vshrl.u32 %v291_v27, 16  ;;  %v368_v33 = vshll.u32 %v291_v27, 16  ;;  %vm6186_vm2 = vmor %vm361_vm0, %vm362_vm1 }
  0x21   : > { %915 = vmatprep.subr.bf16.mxu1 %v5661_v13  ;;  %2511 = vmatprep.subr.bf16.mxu0 %v5663_v14  ;;  %v5684_v30 = vld [vmem:[%s7744_s1 + $0x260] ss:$8 sps:$4 sm:$0xff]   ;;  %v374_v34 = vshll.u32 %v292_v28, 16  ;;  %v378_v35 = vshrl.u32 %v292_v28, 16  ;;  %v5685_v36 = vld [vmem:[%s7744_s1 + $0xf4] ss:$8 sps:$4 sm:$0xff]  }
  0x22   : > { %v5687_v37 = vld [vmem:[%s7744_s1 + $0x274] ss:$8 sps:$4 sm:$0xff]   ;;  %v384_v38 = vshll.u32 %v293_v31, 16  ;;  %v6165_v39 = vld [vmem:[%s6135_s20 + $0xc] sm:$0xf]  ;;  %v367_v41 = vrot.slane %v365_v32, 4 }
  0x23   : > { %v6168_v40 = vld [vmem:[%s6135_s20 + $0x10] sm:$0xf]  ;;  %v370_v42 = vrot.slane %v368_v33, 5  ;;  %v376_v43 = vrot.slane %v374_v34, 5  ;;  %v380_v44 = vrot.slane %v378_v35, 4  ;;  %v389_v47 = vshrl.u32 %v6165_v39, 16 }
  0x24   : > { %916 = vmatpush1.bf16.msra.mxu1 %v5665_v15  ;;  %2512 = vmatpush1.bf16.msra.mxu0 %v5666_v16  ;;  %v6171_v45 = vld [vmem:[%s6135_s20 + $0x14] sm:$0x1]  ;;  %v386_v46 = vrot.slane %v384_v38, 5  ;;  %v392_v48 = vshll.u32 %v6165_v39, 16  ;;  %v398_v49 = vshll.u32 %v6168_v40, 16  ;;  %v402_v54 = vshrl.u32 %v6168_v40, 16 }
  0x25   : > { %917 = vmatprep.subr.bf16.mxu1 %v5667_v17  ;;  %2513 = vmatprep.subr.bf16.mxu0 %v5669_v18  ;;  %v5689_v50 = vld [vmem:[%s7744_s1 + $0xf0] ss:$8 sps:$4 sm:$0xff]   ;;  %v371_v52 = vor.u32 %v370_v42, %v367_v41  ;;  %v381_v53 = vor.u32 %v380_v44, %v376_v43  ;;  %v408_v55 = vshll.u32 %v6171_v45, 16  ;;  %v391_v57 = vrot.slane %v389_v47, 4  ;;  %v5693_v60 = vld [vmem:[%s7744_s1 + $0x284] ss:$8 sps:$4 sm:$0xff]  }
  0x26   : > { %v5690_v51 = vld [vmem:[%s7744_s1 + $0x270] ss:$8 sps:$4 sm:$0xff]   ;;  %v394_v58 = vrot.slane %v392_v48, 5  ;;  %v400_v59 = vrot.slane %v398_v49, 5  ;;  %v404_v0 = vrot.slane %v402_v54, 4  ;;  %vm5968_vm6 = vmmov 0  }
  0x27   : > { %v6194_v61 = vld [vmem:[%s6135_s20 + $0x18] sm:$0xf]  ;;  %v372_v62 = vrot.slane %v371_v52, 4  ;;  %v382_v63 = vrot.slane %v381_v53, 4  ;;  %v410_v1 = vrot.slane %v408_v55, 5  ;;  %vm4483_vm7 = vcmask 130048  }
  0x28   : > { %918 = vmatpush1.bf16.msra.mxu1 %v5671_v19  ;;  %2514 = vmatpush1.bf16.msra.mxu0 %v5672_v20  ;;  %v6197_v3 = vld [vmem:[%s6135_s20 + $0x1c] sm:$0xf]  ;;  %v395_v4 = vor.u32 %v394_v58, %v391_v57  ;;  %v6200_v5 = vld [vmem:[%s6135_s20 + $0x20] sm:$0x1]  ;;  %v413_v6 = vshrl.u32 %v6194_v61, 16  ;;  %v416_v7 = vshll.u32 %v6194_v61, 16  ;;  %v405_v11 = vor.u32 %v404_v0, %v400_v59 }
  0x29   : > { %919 = vmatprep.subr.bf16.mxu1 %v5673_v21  ;;  %2515 = vmatprep.subr.bf16.mxu0 %v5675_v22  ;;  %v422_v8 = vshll.u32 %v6197_v3, 16  ;;  %v377_v9 = vsel %vm6186_vm2, %v372_v62, %v376_v43  ;;  %v387_v10 = vsel %vm6186_vm2, %v382_v63, %v386_v46  ;;  %v426_v12 = vshrl.u32 %v6197_v3, 16  ;;  %v5691_v18 = vld [vmem:[%s7744_s1 + $0x280] ss:$8 sps:$4 sm:$0xff]   ;;  %v6231_v31 = vld [vmem:[%s6135_s20 + $0x2c] sm:$0x1] }
  0x2a   : > { %v4659_v13 = vcombine.low %v377_v9, %v387_v10  ;;  %v396_v14 = vrot.slane %v395_v4, 4  ;;  %v415_v15 = vrot.slane %v413_v6, 4  ;;  %v418_v16 = vrot.slane %v416_v7, 5  ;;  %v5697_v22 = vld [vmem:[%s7744_s1] ss:$8 sps:$4 sm:$0xff]   ;;  %s280_s9 = sand.u32 1, %s5956_s25  }
  0x2b   : > { %v406_v17 = vrot.slane %v405_v11, 4  ;;  %v424_v19 = vrot.slane %v422_v8, 5  ;;  %v428_v20 = vrot.slane %v426_v12, 4  ;;  %v432_v21 = vshll.u32 %v6200_v5, 16  ;;  %v6226_v27 = vld [vmem:[%s6135_s20 + $0x28] sm:$0xf] }
  0x2c   : > { %920 = vmatpush1.bf16.msra.mxu1 %v5677_v23  ;;  %2516 = vmatpush1.bf16.msra.mxu0 %v5678_v24  ;;  %v401_v23 = vsel %vm6186_vm2, %v396_v14, %v400_v59  ;;  %v419_v24 = vor.u32 %v418_v16, %v415_v15  ;;  %v5696_v35 = vld [vmem:[%s7744_s1 + $0x294] ss:$8 sps:$4 sm:$0xff]   ;;  %v450_v42 = vshrl.u32 %v6226_v27, 16  ;;  %v456_v43 = vshll.u32 %v6231_v31, 16  ;;  %v6245_v47 = vld [vmem:[%s6135_s20 + $0x30] sm:$0xf] }
  0x2d   : > { %921 = vmatprep.subr.bf16.mxu1 %v5679_v25  ;;  %2517 = vmatprep.subr.bf16.mxu0 %v5681_v26  ;;  %v5699_v25 = vld [vmem:[%s7744_s1 + $0x4] ss:$8 sps:$4 sm:$0xff]   ;;  %v411_v28 = vsel %vm6186_vm2, %v406_v17, %v410_v1  ;;  %v6248_v48 = vld [vmem:[%s6135_s20 + $0x34] sm:$0xf]  ;;  %v461_v53 = vshrl.u32 %v6245_v47, 16  ;;  %v464_v58 = vshll.u32 %v6245_v47, 16  ;;  %v6284_v10 = vcombine.low %v6165_v39, %v6168_v40 }
  0x2e   : > { %v6223_v26 = vld [vmem:[%s6135_s20 + $0x24] sm:$0xf]  ;;  %v4660_v33 = vcombine.low %v401_v23, %v411_v28  ;;  %v420_v34 = vrot.slane %v419_v24, 4  ;;  %v452_v52 = vrot.slane %v450_v42, 4  ;;  %v6263_v57 = vld [vmem:[%s6135_s20 + $0x38] sm:$0x1] }
  0x2f   : > { %v437_v32 = vshrl.u32 %v6223_v26, 16  ;;  %v5702_v55 = vld [vmem:[%s7744_s1 + $0x2a4] ss:$8 sps:$4 sm:$0xff]   ;;  %v470_v59 = vshll.u32 %v6248_v48, 16  ;;  %v458_v62 = vrot.slane %v456_v43, 5  ;;  %v463_v0 = vrot.slane %v461_v53, 4 }
  0x30   : > { %922 = vmatpush1.bf16.msra.mxu1 %v5683_v29  ;;  %2518 = vmatpush1.bf16.msra.mxu0 %v5684_v30  ;;  %v429_v29 = vor.u32 %v428_v20, %v424_v19  ;;  %v434_v30 = vrot.slane %v432_v21, 5  ;;  %v425_v49 = vsel %vm6186_vm2, %v420_v34, %v424_v19  ;;  %v5700_v63 = vld [vmem:[%s7744_s1 + $0x2a0] ss:$8 sps:$4 sm:$0xff]   ;;  %v474_v1 = vshrl.u32 %v6248_v48, 16  ;;  %v5706_v4 = vld [vmem:[%s7744_s1 + $0x10] ss:$8 sps:$4 sm:$0xff]  }
  0x31   : > { %923 = vmatprep.subr.bf16.mxu1 %v5685_v36  ;;  %2519 = vmatprep.subr.bf16.mxu0 %v5687_v37  ;;  %v440_v36 = vshll.u32 %v6223_v26, 16  ;;  %v446_v37 = vshll.u32 %v6226_v27, 16  ;;  %v439_v41 = vrot.slane %v437_v32, 4  ;;  %v466_v7 = vrot.slane %v464_v58, 5  ;;  %v5708_v9 = vld [vmem:[%s7744_s1 + $0x14] ss:$8 sps:$4 sm:$0xff]  }
  0x32   : > { %v430_v38 = vrot.slane %v429_v29, 4  ;;  %v6277_v8 = vrot.slane %v470_v59, 5  ;;  %7771 = vst [vmem:[#allocation6_spill] sm:$0xff] %v6284_v10  ;;  %v306_v14 = vld [vmem:[%s6135_s20 + $0x3c] sm:$0xf]  ;;  %v480_v21 = vshll.u32 %v6263_v57, 16 }
  0x33   : > { %v442_v44 = vrot.slane %v440_v36, 5  ;;  %v6242_v46 = vrot.slane %v446_v37, 5  ;;  %v467_v15 = vor.u32 %v466_v7, %v463_v0  ;;  %v5705_v16 = vld [vmem:[%s7744_s1 + $0x2b4] ss:$8 sps:$4 sm:$0xff]   ;;  %v6291_v17 = vld [vmem:[%s6135_s20 + $0x40] sm:$0xf] }
  0x34   : > { %924 = vmatpush1.bf16.msra.mxu1 %v5689_v50  ;;  %2520 = vmatpush1.bf16.msra.mxu0 %v5690_v51  ;;  %v435_v50 = vsel %vm6186_vm2, %v430_v38, %v434_v30  ;;  %v5694_v51 = vld [vmem:[%s7744_s1 + $0x290] ss:$8 sps:$4 sm:$0xff]   ;;  %v488_v19 = vshll.u32 %v306_v14, 16  ;;  %v498_v23 = vshrl.u32 %v6291_v17, 16  ;;  %v5711_v29 = vld [vmem:[%s7744_s1 + $0x2c4] ss:$8 sps:$4 sm:$0xff]  }
  0x35   : > { %2871 = vmatprep.subr.bf16.mxu0 %v5693_v60  ;;  %1278 = vmatprep.subr.bf16.mxu1 %v5699_v25  ;;  %v443_v54 = vor.u32 %v442_v44, %v439_v41  ;;  %v453_v60 = vor.u32 %v452_v52, %v6242_v46  ;;  %v6275_v6 = vcombine.low %v425_v49, %v435_v50  ;;  %v5703_v28 = vld [vmem:[%s7744_s1 + $0x2b0] ss:$8 sps:$4 sm:$0xff]   ;;  %v468_v30 = vrot.slane %v467_v15, 4  ;;  %v6312_v36 = vld [vmem:[%s6135_s20 + $0x44] sm:$0x1]  ;;  %s4988_s18 = sshll.u32 %s6032_s28, 4 }
  0x36   : > { %v500_v38 = vrot.slane %v498_v23, 4  ;;  %v309_v42 = vld [vmem:[%s6135_s20 + $0x48] sm:$0xf]  ;;  %v5717_v49 = vld [vmem:[%s7744_s1 + $0x24] ss:$8 sps:$4 sm:$0xff]   ;;  %v504_v52 = vshll.u32 %v6312_v36, 16  ;;  %s7701_s29 = scalar_lea.hbm %s7750_s7, %s4988_s18 }
  0x37   : > { %942 = vmatmul.mubr.bf16.vlgmr.msra.gmra.mrb[0].mxu1 %v4659_v13  ;;  %2538 = vmatmul.mubr.bf16.vlgmr.msra.gmra.mrb[0].mxu0 %v4660_v33  ;;  %7770 = vst [vmem:[#allocation5_spill] sm:$0xff] %v6275_v6  ;;  %v444_v11 = vrot.slane %v443_v54, 4  ;;  %v454_v12 = vrot.slane %v453_v60, 4  ;;  %v476_v13 = vrot.slane %v474_v1, 4  ;;  %v5715_v43 = vld [vmem:[%s7744_s1 + $0x20] ss:$8 sps:$4 sm:$0xff]   ;;  %v473_v50 = vsel %vm6186_vm2, %v468_v30, %v6277_v8 }
  0x38   : > { %951 = vmatprep.mubr.bf16.mxu1 %v7752_v2  ;;  %1279 = vmatpush1.bf16.msra.mxu1 %v5697_v22  ;;  %v494_v22 = vshll.u32 %v6291_v17, 16  ;;  %v5709_v44 = vld [vmem:[%s7744_s1 + $0x2c0] ss:$8 sps:$4 sm:$0xff]   ;;  %v5714_v53 = vld [vmem:[%s7744_s1 + $0x2d4] ss:$8 sps:$4 sm:$0xff]   ;;  %v6341_v54 = vcombine.low %v6194_v61, %v6197_v3  ;;  %v509_v59 = vshrl.u32 %v309_v42, 16 }
  0x39   : > { %2872 = vmatpush1.bf16.msra.mxu0 %v5691_v18  ;;  %2547 = vmatprep.mubr.bf16.mxu0 %v7752_v2  ;;  %v485_v18 = vshrl.u32 %v306_v14, 16  ;;  %v477_v20 = vor.u32 %v476_v13, %v6277_v8  ;;  %v449_v24 = vsel %vm6186_vm2, %v444_v11, %v6242_v46  ;;  %v459_v25 = vsel %vm6186_vm2, %v454_v12, %v458_v62  ;;  %v6326_v46 = vld [vmem:[%s6135_s20 + $0x4c] sm:$0xf]  ;;  %v5712_v0 = vld [vmem:[%s7744_s1 + $0x2d0] ss:$8 sps:$4 sm:$0xff]   ;;  %s281_s19 = scalar_lea.vmem [#allocation2], %s280_s9 }
  0x3a   : > { %2873 = vmatprep.subr.bf16.mxu0 %v5696_v35  ;;  %1280 = vmatprep.subr.bf16.mxu1 %v5708_v9  ;;  %v482_v35 = vrot.slane %v480_v21, 5  ;;  %v6314_v37 = vrot.slane %v494_v22, 5  ;;  %v6316_v41 = vcombine.low %v449_v24, %v459_v25  ;;  %7773 = vst [vmem:[#allocation8_spill] sm:$0xff] %v6341_v54  ;;  %v512_v60 = vshll.u32 %v309_v42, 16  ;;  %v6355_v1 = vld [vmem:[%s6135_s20 + $0x54] sm:$0xf] }
  0x3b   : > { %v487_v32 = vrot.slane %v485_v18, 4  ;;  %v478_v34 = vrot.slane %v477_v20, 4  ;;  %v518_v62 = vshll.u32 %v6326_v46, 16  ;;  %v506_v7 = vrot.slane %v504_v52, 5  ;;  %v6360_v8 = vld [vmem:[%s6135_s20 + $0x58] sm:$0xf] }
  0x3c   : > { %1281 = vmatpush1.bf16.msra.mxu1 %v5706_v4  ;;  %7772 = vst [vmem:[#allocation7_spill] sm:$0xff] %v6316_v41  ;;  %v501_v58 = vor.u32 %v500_v38, %v6314_v37  ;;  %v5720_v9 = vld [vmem:[%s7744_s1 + $0x2e4] ss:$8 sps:$4 sm:$0xff]   ;;  %v6367_v11 = vcombine.low %v6223_v26, %v6226_v27  ;;  %v6370_v14 = vld [vmem:[%s6135_s20 + $0x50] sm:$0x1]  ;;  %v511_v15 = vrot.slane %v509_v59, 4 }
  0x3d   : > { %2874 = vmatpush1.bf16.msra.mxu0 %v5694_v51  ;;  %1282 = vmatprep.subr.bf16.mxu1 %v5717_v49  ;;  %v6372_v18 = vrot.slane %v518_v62, 5  ;;  %v533_v20 = vshrl.u32 %v6355_v1, 16  ;;  %v536_v21 = vshll.u32 %v6355_v1, 16  ;;  %v542_v22 = vshll.u32 %v6360_v8, 16  ;;  %v5718_v24 = vld [vmem:[%s7744_s1 + $0x2e0] ss:$8 sps:$4 sm:$0xff]  }
  0x3e   : > { %2875 = vmatprep.subr.bf16.mxu0 %v5702_v55  ;;  %v483_v55 = vsel %vm6186_vm2, %v478_v34, %v482_v35  ;;  %7775 = vst [vmem:[#allocation10_spill] sm:$0xff] %v6367_v11  ;;  %v502_v13 = vrot.slane %v501_v58, 4  ;;  %v546_v23 = vshrl.u32 %v6360_v8, 16  ;;  %v5723_v25 = vld [vmem:[%s7744_s1 + $0x2f4] ss:$8 sps:$4 sm:$0xff]   ;;  %v1502_v52 = vrot.slane %v6171_v45, 5 }
  0x3f   : > { %952 = vmatmul.mubr.bf16.gmra.mrb[4].mxu1 %v4660_v33  ;;  %2548 = vmatmul.mubr.bf16.gmra.mrb[4].mxu0 %v6275_v6  ;;  %v490_v33 = vrot.slane %v488_v19, 5  ;;  %v6357_v4 = vcombine.low %v473_v50, %v483_v55  ;;  %v535_v34 = vrot.slane %v533_v20, 4  ;;  %v538_v35 = vrot.slane %v536_v21, 5  ;;  %v5721_v49 = vld [vmem:[%s7744_s1 + $0x2f0] ss:$8 sps:$4 sm:$0xff]   ;;  %s4562_s13 = scalar_lea.sflag [#allocation3], %s280_s9 }
  0x40   : > { %961 = vmatprep.mubr.bf16.mxu1 %v7752_v2  ;;  %2557 = vmatprep.mubr.bf16.mxu0 %v7752_v2  ;;  %v507_v42 = vsel %vm6186_vm2, %v502_v13, %v506_v7  ;;  %v6407_v50 = vld [vmem:[%s6135_s20 + $0x5c] sm:$0x1]  ;;  %v6415_v58 = vld [vmem:[%s6135_s20 + $0x60] sm:$0xf]  ;;  %v6721_v54 = vld [vmem:[%s6135_s20 + $0xb4] sm:$0xf] }
  0x41   : > { %2876 = vmatpush1.bf16.msra.mxu0 %v5700_v63  ;;  %v491_v51 = vor.u32 %v490_v33, %v487_v32  ;;  %v522_v63 = vshrl.u32 %v6326_v46, 16  ;;  %1283 = vmatpush1.bf16.msra.mxu1 %v5715_v43  ;;  %7774 = vst [vmem:[#allocation9_spill] sm:$0xff] %v6357_v4  ;;  %v528_v32 = vshll.u32 %v6370_v14, 16  ;;  %v6401_v43 = vrot.slane %v542_v22, 5  ;;  %s5970_s28 = smov [#allocation2]  }
  0x42   : > { %2877 = vmatprep.subr.bf16.mxu0 %v5705_v16  ;;  %v514_v16 = vrot.slane %v512_v60, 5  ;;  %v552_v7 = vshll.u32 %v6407_v50, 16  ;;  %v557_v13 = vshrl.u32 %v6415_v58, 16  ;;  %vm4559_vm8 = vcmask 65536   ;;  %s5906_s14 = sshll.u32 %s5970_s28, 4  ;;  %s5907_s14 = int_to_ptr.vmem [resolvable:$false] %s5906_s14 }
  0x43   : > { %v492_v12 = vrot.slane %v491_v51, 4  ;;  %v524_v19 = vrot.slane %v522_v63, 4  ;;  %v4724_v51 = vrot.slane %v6165_v39, 9  ;;  %v530_v55 = vrot.slane %v528_v32, 5  ;;  %v6426_v63 = vld [vmem:[%s6135_s20 + $0x64] sm:$0xf] }
  0x44   : > { %v515_v30 = vor.u32 %v514_v16, %v511_v15  ;;  %v539_v39 = vor.u32 %v538_v35, %v535_v34  ;;  %v566_v20 = vshll.u32 %v6426_v63, 16  ;;  %v4725_v32 = vrot.slane %v6194_v61, 9  ;;  %v6463_v35 = vld [vmem:[%s6135_s20 + $0x70] sm:$0xf]  ;;  %s5908_s22 = scalar_lea.vmem %s5907_s14, 32 }
  0x45   : > { %2878 = vmatpush1.bf16.msra.mxu0 %v5703_v28  ;;  %v5724_v28 = vld [vmem:[%s7744_s1 + $0x30] ss:$8 sps:$4 sm:$0xff]   ;;  %v525_v33 = vor.u32 %v524_v19, %v6372_v18  ;;  %v497_v38 = vsel %vm6186_vm2, %v492_v12, %v6314_v37  ;;  %v5729_v37 = vld [vmem:[%s7744_s1 + $0x304] ss:$8 sps:$4 sm:$0xff]   ;;  %v560_v19 = vshll.u32 %v6415_v58, 16 }
  0x46   : > { %2879 = vmatprep.subr.bf16.mxu0 %v5711_v29  ;;  %v5726_v29 = vld [vmem:[%s7744_s1 + $0x34] ss:$8 sps:$4 sm:$0xff]   ;;  %v6423_v60 = vcombine.low %v497_v38, %v507_v42  ;;  %v5732_v12 = vld [vmem:[%s7744_s1 + $0x44] ss:$8 sps:$4 sm:$0xff]   ;;  %v540_v22 = vrot.slane %v539_v39, 4  ;;  %v1506_v38 = vrot.slane %v6197_v3, 5 }
  0x47   : > { %962 = vmatmul.mubr.bf16.gmra.mrb[8].mxu1 %v6275_v6  ;;  %2558 = vmatmul.mubr.bf16.gmra.mrb[8].mxu0 %v6316_v41  ;;  %v526_v62 = vrot.slane %v525_v33, 4  ;;  %v562_v34 = vrot.slane %v560_v19, 5  ;;  %v1509_v42 = vrot.slane %v6200_v5, 5  ;;  %v594_v39 = vshrl.u32 %v6463_v35, 16 }
  0x48   : > { %971 = vmatprep.mubr.bf16.mxu1 %v7752_v2  ;;  %2567 = vmatprep.mubr.bf16.mxu0 %v7752_v2  ;;  %7778 = vst [vmem:[#allocation11_spill] sm:$0xff] %v6423_v60  ;;  %v1507_v3 = vsel %vm6419_vm5, %v4725_v32, %v1506_v38  ;;  %v1508_v5 = vrot.slane %v1506_v38, 4  ;;  %v1516_v32 = vrot.slane %v6231_v31, 5 }
  0x49   : > { %2880 = vmatpush1.bf16.msra.mxu0 %v5709_v44  ;;  %1284 = vmatprep.subr.bf16.mxu1 %v5726_v29  ;;  %v548_v44 = vrot.slane %v546_v23, 4  ;;  %v531_v21 = vsel %vm6186_vm2, %v526_v62, %v530_v55  ;;  %v570_v23 = vshrl.u32 %v6426_v63, 16  ;;  %v5738_v55 = vld [vmem:[%s7744_s1 + $0x54] ss:$8 sps:$4 sm:$0xff]   ;;  %v590_v62 = vshll.u32 %v6463_v35, 16 }
  0x4a   : > { %2881 = vmatprep.subr.bf16.mxu0 %v5714_v53  ;;  %1285 = vmatpush1.bf16.msra.mxu1 %v5724_v28  ;;  %v516_v53 = vrot.slane %v515_v30, 4  ;;  %v6455_v28 = vld [vmem:[%s6135_s20 + $0x6c] sm:$0xf]  ;;  %v559_v30 = vrot.slane %v557_v13, 4 }
  0x4b   : > { %v549_v45 = vor.u32 %v548_v44, %v6401_v43  ;;  %1286 = vmatprep.subr.bf16.mxu1 %v5732_v12  ;;  %v545_v44 = vsel %vm6186_vm2, %v540_v22, %v6401_v43  ;;  %v581_v61 = vshrl.u32 %v6455_v28, 16  ;;  %v5736_v43 = vld [vmem:[%s7744_s1 + $0x50] ss:$8 sps:$4 sm:$0xff]   ;;  %v1513_v12 = vrot.slane %v6226_v27, 5  ;;  %v6516_v22 = vld [vmem:[%s6135_s20 + $0x88] sm:$0xf] }
  0x4c   : > { %v521_v16 = vsel %vm6186_vm2, %v516_v53, %v6372_v18  ;;  %v584_v53 = vshll.u32 %v6455_v28, 16 }
  0x4d   : > { %2882 = vmatpush1.bf16.msra.mxu0 %v5712_v0  ;;  %v1499_v0 = vrot.slane %v6168_v40, 5  ;;  %v550_v18 = vrot.slane %v549_v45, 4  ;;  %v6460_v33 = vcombine.low %v521_v16, %v531_v21  ;;  %v6493_v45 = vld [vmem:[%s6135_s20 + $0x78] sm:$0xf]  ;;  %v6504_v16 = vld [vmem:[%s6135_s20 + $0x7c] sm:$0xf] }
  0x4e   : > { %2883 = vmatprep.subr.bf16.mxu0 %v5720_v9  ;;  %v5730_v9 = vld [vmem:[%s7744_s1 + $0x40] ss:$8 sps:$4 sm:$0xff]   ;;  %v6513_v21 = vld [vmem:[%s6135_s20 + $0x74] sm:$0x1]  ;;  %v586_v27 = vrot.slane %v584_v53, 5  ;;  %v614_v38 = vshll.u32 %v6504_v16, 16 }
  0x4f   : > { %972 = vmatmul.mubr.bf16.gmra.mrb[12].mxu1 %v6316_v41  ;;  %2568 = vmatmul.mubr.bf16.gmra.mrb[12].mxu0 %v6357_v4  ;;  %v1500_v40 = vsel %vm6419_vm5, %v4724_v51, %v1499_v0  ;;  %v1501_v15 = vrot.slane %v1499_v0, 4  ;;  %7780 = vst [vmem:[#allocation13_spill] sm:$0xff] %v6460_v33  ;;  %v6473_v51 = vrot.slane %v566_v20, 5  ;;  %v6509_v20 = vld [vmem:[%s6135_s20 + $0x84] sm:$0xf]  ;;  %v642_v53 = vshrl.u32 %v6516_v22, 16 }
  0x50   : > { %981 = vmatprep.mubr.bf16.mxu1 %v7752_v2  ;;  %2577 = vmatprep.mubr.bf16.mxu0 %v7752_v2 }
  0x51   : > { %2884 = vmatpush1.bf16.msra.mxu0 %v5718_v24  ;;  %v1503_v24 = vsel %vm6419_vm5, %v1501_v15, %v1502_v52  ;;  %1287 = vmatpush1.bf16.msra.mxu1 %v5730_v9  ;;  %v4726_v9 = vrot.slane %v6223_v26, 9  ;;  %v583_v26 = vrot.slane %v581_v61, 4  ;;  %v632_v61 = vshll.u32 %v6509_v20, 16 }
  0x52   : > { %2885 = vmatprep.subr.bf16.mxu0 %v5723_v25  ;;  %v554_v25 = vrot.slane %v552_v7, 5  ;;  %v6457_v29 = vcombine.low %v1500_v40, %v1503_v24  ;;  %v1510_v7 = vsel %vm6419_vm5, %v1508_v5, %v1509_v42  ;;  %1288 = vmatprep.subr.bf16.mxu1 %v5738_v55  ;;  %v563_v40 = vor.u32 %v562_v34, %v559_v30 }
  0x53   : > { %v6506_v19 = vcombine.low %v1507_v3, %v1510_v7  ;;  %v1515_v24 = vrot.slane %v1513_v12, 4  ;;  %v605_v30 = vshrl.u32 %v6493_v45, 16  ;;  %v608_v34 = vshll.u32 %v6493_v45, 16  ;;  %v5744_v3 = vld [vmem:[%s7744_s1 + $0x64] ss:$8 sps:$4 sm:$0xff]  }
  0x54   : > { %7779 = vst [vmem:[#allocation12_spill] sm:$0xff] %v6457_v29  ;;  %v555_v52 = vsel %vm6186_vm2, %v550_v18, %v554_v25  ;;  %v6520_v18 = vrot.slane %v590_v62, 5  ;;  %v596_v25 = vrot.slane %v594_v39, 4  ;;  %v618_v42 = vshrl.u32 %v6504_v16, 16 }
  0x55   : > { %2886 = vmatpush1.bf16.msra.mxu0 %v5721_v49  ;;  %v6471_v49 = vld [vmem:[%s6135_s20 + $0x68] sm:$0x1]  ;;  %v6500_v13 = vcombine.low %v545_v44, %v555_v52  ;;  %1289 = vmatpush1.bf16.msra.mxu1 %v5736_v43  ;;  %v629_v44 = vshrl.u32 %v6509_v20, 16  ;;  %v638_v52 = vshll.u32 %v6516_v22, 16  ;;  %v1517_v31 = vsel %vm6419_vm5, %v1515_v24, %v1516_v32 }
  0x56   : > { %3231 = vmatprep.subr.bf16.mxu0 %v5729_v37  ;;  %v572_v37 = vrot.slane %v570_v23, 4  ;;  %v576_v0 = vshll.u32 %v6471_v49, 16  ;;  %v1514_v23 = vsel %vm6419_vm5, %v4726_v9, %v1513_v12  ;;  %v564_v5 = vrot.slane %v563_v40, 4  ;;  %v6544_v9 = vld [vmem:[%s6135_s20 + $0x80] sm:$0x1]  ;;  %1290 = vmatprep.subr.bf16.mxu1 %v5744_v3 }
  0x57   : > { %982 = vmatmul.mubr.bf16.gmra.mrb[16].mxu1 %v6357_v4  ;;  %2578 = vmatmul.mubr.bf16.gmra.mrb[16].mxu0 %v6423_v60  ;;  %7781 = vst [vmem:[#allocation14_spill] sm:$0xff] %v6500_v13  ;;  %v6539_v62 = vcombine.low %v1514_v23, %v1517_v31  ;;  %v587_v39 = vor.u32 %v586_v27, %v583_v26  ;;  %v600_v7 = vshll.u32 %v6513_v21, 16  ;;  %v607_v12 = vrot.slane %v605_v30, 4  ;;  %v5748_v30 = vld [vmem:[%s7744_s1 + $0x70] ss:$8 sps:$4 sm:$0xff]  }
  0x58   : > { %991 = vmatprep.mubr.bf16.mxu1 %v7752_v2  ;;  %2587 = vmatprep.mubr.bf16.mxu0 %v7752_v2  ;;  %v573_v15 = vor.u32 %v572_v37, %v6473_v51  ;;  %v5742_v37 = vld [vmem:[%s7744_s1 + $0x60] ss:$8 sps:$4 sm:$0xff]   ;;  %v578_v55 = vrot.slane %v576_v0, 5  ;;  %v597_v24 = vor.u32 %v596_v25, %v6520_v18  ;;  %v610_v32 = vrot.slane %v608_v34, 5 }
  0x59   : > { %v620_v40 = vrot.slane %v618_v42, 4  ;;  %1291 = vmatpush1.bf16.msra.mxu1 %v5742_v37  ;;  %v631_v0 = vrot.slane %v629_v44, 4  ;;  %v634_v26 = vrot.slane %v632_v61, 5  ;;  %v640_v27 = vrot.slane %v638_v52, 5 }
  0x5a   : > { %v574_v43 = vrot.slane %v573_v15, 4  ;;  %v6549_v15 = vld [vmem:[%s6135_s20 + $0x8c] sm:$0x1]  ;;  %v644_v23 = vrot.slane %v642_v53, 4  ;;  %v569_v25 = vsel %vm6186_vm2, %v564_v5, %v6473_v51  ;;  %v588_v42 = vrot.slane %v587_v39, 4 }
  0x5b   : > { %v602_v44 = vrot.slane %v600_v7, 5  ;;  %v624_v37 = vshll.u32 %v6544_v9, 16  ;;  %v598_v61 = vrot.slane %v597_v24, 4  ;;  %v611_v52 = vor.u32 %v610_v32, %v607_v12  ;;  %v6579_v12 = vld [vmem:[%s6135_s20 + $0x94] sm:$0xf] }
  0x5c   : > { %v579_v34 = vsel %vm6186_vm2, %v574_v43, %v578_v55  ;;  %v648_v31 = vshll.u32 %v6549_v15, 16  ;;  %v635_v3 = vor.u32 %v634_v26, %v631_v0  ;;  %v645_v5 = vor.u32 %v644_v23, %v640_v27  ;;  %v6569_v43 = vld [vmem:[%s6135_s20 + $0x90] sm:$0xf]  ;;  %v5759_v55 = vld [vmem:[%s7744_s1 + $0x104] ss:$8 sps:$4 sm:$0xff]  }
  0x5d   : > { %v6566_v51 = vcombine.low %v569_v25, %v579_v34  ;;  %v593_v39 = vsel %vm6186_vm2, %v588_v42, %v6520_v18  ;;  %v626_v7 = vrot.slane %v624_v37, 5  ;;  %v603_v24 = vsel %vm6186_vm2, %v598_v61, %v602_v44  ;;  %v6585_v26 = vld [vmem:[%s6135_s20 + $0x98] sm:$0x1] }
  0x5e   : > { %v612_v32 = vrot.slane %v611_v52, 4  ;;  %v650_v0 = vrot.slane %v648_v31, 5  ;;  %v636_v23 = vrot.slane %v635_v3, 4  ;;  %v653_v18 = vshrl.u32 %v6569_v43, 16 }
  0x5f   : > { %992 = vmatmul.mubr.bf16.gmra.mrb[20].mxu1 %v6423_v60  ;;  %2588 = vmatmul.mubr.bf16.gmra.mrb[20].mxu0 %v6460_v33  ;;  %v616_v60 = vrot.slane %v614_v38, 5  ;;  %v5750_v38 = vld [vmem:[%s7744_s1 + $0x74] ss:$8 sps:$4 sm:$0xff]   ;;  %7782 = vst [vmem:[#allocation15_spill] sm:$0xff] %v6566_v51  ;;  %v656_v25 = vshll.u32 %v6569_v43, 16  ;;  %v662_v34 = vshll.u32 %v6579_v12, 16  ;;  %v6593_v42 = vcombine.low %v593_v39, %v603_v24 }
  0x60   : > { %1001 = vmatprep.mubr.bf16.mxu1 %v7752_v2  ;;  %2597 = vmatprep.mubr.bf16.mxu0 %v7752_v2  ;;  %v672_v61 = vshll.u32 %v6585_v26, 16  ;;  %v641_v52 = vsel %vm6186_vm2, %v636_v23, %v640_v27  ;;  %v655_v31 = vrot.slane %v653_v18, 4  ;;  %v4730_v24 = vrot.slane %v6355_v1, 9 }
  0x61   : > { %v621_v53 = vor.u32 %v620_v40, %v616_v60  ;;  %1292 = vmatprep.subr.bf16.mxu1 %v5750_v38  ;;  %v666_v38 = vshrl.u32 %v6579_v12, 16  ;;  %7783 = vst [vmem:[#allocation16_spill] sm:$0xff] %v6593_v42  ;;  %v617_v44 = vsel %vm6186_vm2, %v612_v32, %v616_v60  ;;  %v658_v3 = vrot.slane %v656_v25, 5  ;;  %v6610_v60 = vld [vmem:[%s6135_s20 + $0x9c] sm:$0xf] }
  0x62   : > { %1293 = vmatpush1.bf16.msra.mxu1 %v5748_v30  ;;  %v646_v30 = vrot.slane %v645_v5, 4  ;;  %v6605_v5 = vrot.slane %v662_v34, 5  ;;  %v6617_v27 = vrot.slane %v672_v61, 5  ;;  %v677_v18 = vshrl.u32 %v6610_v60, 16 }
  0x63   : > { %v622_v40 = vrot.slane %v621_v53, 4  ;;  %1763 = vmatprep.subr.bf16.mxu1 %v5759_v55  ;;  %v6607_v55 = vrot.slane %v666_v38, 4  ;;  %v659_v32 = vor.u32 %v658_v3, %v655_v31  ;;  %v1541_v25 = vrot.slane %v6360_v8, 5 }
  0x64   : > { %v651_v53 = vsel %vm6186_vm2, %v646_v30, %v650_v0  ;;  %v6626_v30 = vld [vmem:[%s6135_s20 + $0xa0] sm:$0xf]  ;;  %v1544_v34 = vrot.slane %v6407_v50, 5  ;;  %v4731_v38 = vrot.slane %v6415_v58, 9  ;;  %v1548_v61 = vrot.slane %v6426_v63, 5 }
  0x65   : > { %v627_v37 = vsel %vm6186_vm2, %v622_v40, %v626_v7  ;;  %v6615_v7 = vcombine.low %v641_v52, %v651_v53  ;;  %v1551_v52 = vrot.slane %v6471_v49, 5  ;;  %v5727_v53 = vld [vmem:[%s7744_s1 + $0x300] ss:$8 sps:$4 sm:$0xff]   ;;  %v1542_v31 = vsel %vm6419_vm5, %v4730_v24, %v1541_v25  ;;  %v5735_v40 = vld [vmem:[%s7744_s1 + $0x314] ss:$8 sps:$4 sm:$0xff]  }
  0x66   : > { %v6613_v39 = vcombine.low %v617_v44, %v627_v37  ;;  %v680_v37 = vshll.u32 %v6610_v60, 16  ;;  %v1543_v3 = vrot.slane %v1541_v25, 4  ;;  %v4732_v50 = vrot.slane %v6455_v28, 9 }
  0x67   : > { %1002 = vmatmul.mubr.bf16.gmra.mrb[24].mxu1 %v6460_v33  ;;  %2598 = vmatmul.mubr.bf16.gmra.mrb[24].mxu0 %v6500_v13  ;;  %v1555_v23 = vrot.slane %v6463_v35, 5  ;;  %v6647_v0 = vrot.slane %v659_v32, 4  ;;  %v686_v49 = vshll.u32 %v6626_v30, 16  ;;  %v1549_v44 = vsel %vm6419_vm5, %v4731_v38, %v1548_v61 }
  0x68   : > { %1011 = vmatprep.mubr.bf16.mxu1 %v7752_v2  ;;  %2607 = vmatprep.mubr.bf16.mxu0 %v7752_v2  ;;  %v1545_v24 = vsel %vm6419_vm5, %v1543_v3, %v1544_v34  ;;  %v1558_v4 = vrot.slane %v6513_v21, 5  ;;  %v4733_v38 = vrot.slane %v6493_v45, 9  ;;  %v5733_v34 = vld [vmem:[%s7744_s1 + $0x310] ss:$8 sps:$4 sm:$0xff]   ;;  %v4734_v3 = vrot.slane %v6509_v20, 9 }
  0x69   : > { %v1556_v25 = vsel %vm6419_vm5, %v4732_v50, %v1555_v23  ;;  %v6659_v33 = vcombine.low %v1542_v31, %v1545_v24  ;;  %v1565_v31 = vrot.slane %v6544_v9, 5  ;;  %v5741_v21 = vld [vmem:[%s7744_s1 + $0x324] ss:$8 sps:$4 sm:$0xff]   ;;  %v1572_v50 = vrot.slane %v6549_v15, 5 }
  0x6f   : > { %1012 = vmatmul.mubr.bf16.gmra.mrb[28].mxu1 %v6500_v13  ;;  %2608 = vmatmul.mubr.bf16.gmra.mrb[28].mxu0 %v6566_v51  ;;  %v1557_v13 = vrot.slane %v1555_v23, 4  ;;  %v1562_v23 = vrot.slane %v6504_v16, 5 }
  0x70   : > { %1021 = vmatprep.mubr.bf16.mxu1 %v7752_v2  ;;  %2617 = vmatprep.mubr.bf16.mxu0 %v7752_v2 }
  0x71   : > { %v1564_v24 = vrot.slane %v1562_v23, 4 }
  0x77   : > { %1022 = vmatmul.mubr.bf16.gmra.mrb[32].mxu1 %v6566_v51  ;;  %2618 = vmatmul.mubr.bf16.gmra.mrb[32].mxu0 %v6593_v42  ;;  %v6652_v51 = vrot.slane %v677_v18, 4  ;;  %v7784_v18 = vmov 0  }
  0x78   : > { %1031 = vmatprep.mubr.bf16.mxu1 %v7752_v2  ;;  %2903 = vmatprep.mubr.bf16.mxu0 %v7752_v2  ;;  %v1550_v2 = vrot.slane %v1548_v61, 4 }
  0x7a   : > { %v1552_v32 = vsel %vm6419_vm5, %v1550_v2, %v1551_v52  ;;  %v6675_v2 = vrot.slane %v680_v37, 5  ;;  %v1559_v52 = vsel %vm6419_vm5, %v1557_v13, %v1558_v4  ;;  %v1563_v37 = vsel %vm6419_vm5, %v4733_v38, %v1562_v23  ;;  %v6691_v4 = vld [vmem:[%s6135_s20 + $0xa4] sm:$0x1]  ;;  %v5739_v38 = vld [vmem:[%s7744_s1 + $0x320] ss:$8 sps:$4 sm:$0xff]  }
  0x7b   : > { %v6669_v61 = vcombine.low %v1549_v44, %v1552_v32  ;;  %v1569_v44 = vrot.slane %v6516_v22, 5  ;;  %v6685_v9 = vcombine.low %v1556_v25, %v1559_v52  ;;  %v4735_v32 = vrot.slane %v6569_v43, 9  ;;  %v6702_v23 = vld [vmem:[%s6135_s20 + $0xa8] sm:$0xf] }
  0x7c   : > { %v1579_v25 = vrot.slane %v6585_v26, 5  ;;  %v690_v52 = vshrl.u32 %v6626_v30, 16  ;;  %v6712_v26 = vld [vmem:[%s6135_s20 + $0xb0] sm:$0x1]  ;;  %v1586_v10 = vrot.slane %v6691_v4, 5 }
  0x7d   : > { %7785 = vst [vmem:[#allocation17_spill] sm:$0xff] %v6685_v9  ;;  %v1570_v13 = vsel %vm6419_vm5, %v4734_v3, %v1569_v44  ;;  %v1571_v15 = vrot.slane %v1569_v44, 4  ;;  %v4736_v3 = vrot.slane %v6610_v60, 9  ;;  %v1583_v44 = vrot.slane %v6626_v30, 5 }
  0x7f   : > { %1032 = vmatmul.mubr.bf16.gmra.mrb[36].mxu1 %v6593_v42  ;;  %2904 = vmatmul.mubr.bf16.vlgmr.msra.gmra.mrb[0].mxu0 %v6457_v29  ;;  %v1566_v42 = vsel %vm6419_vm5, %v1564_v24, %v1565_v31  ;;  %v1573_v6 = vsel %vm6419_vm5, %v1571_v15, %v1572_v50  ;;  %v1584_v24 = vsel %vm6419_vm5, %v4736_v3, %v1583_v44  ;;  %v1585_v9 = vrot.slane %v1583_v44, 4  ;;  %v6732_v50 = vld [vmem:[%s6135_s20 + $0xb8] sm:$0xf] }
  0x80   : > { %1041 = vmatprep.mubr.bf16.mxu1 %v7784_v18  ;;  %3232 = vmatpush1.bf16.msra.mxu0 %v5727_v53  ;;  %v1576_v53 = vrot.slane %v6579_v12, 5  ;;  %v6714_v41 = vcombine.low %v1563_v37, %v1566_v42  ;;  %v6723_v31 = vcombine.low %v1570_v13, %v1573_v6  ;;  %v6729_v42 = vrot.slane %v686_v49, 5  ;;  %v6735_v37 = vld [vmem:[%s6135_s20 + $0xbc] sm:$0x1]  ;;  %v5745_v49 = vld [vmem:[%s7744_s1 + $0x330] ss:$8 sps:$4 sm:$0xff]  }
  0x81   : > { %2913 = vmatprep.mubr.bf16.mxu0 %v7784_v18  ;;  %3233 = vmatprep.subr.bf16.mxu0 %v5735_v40  ;;  %v6705_v40 = vld [vmem:[%s6135_s20 + $0xac] sm:$0xf]  ;;  %v5747_v6 = vld [vmem:[%s7744_s1 + $0x334] ss:$8 sps:$4 sm:$0xff]   ;;  %v1587_v15 = vsel %vm6419_vm5, %v1585_v9, %v1586_v10  ;;  %v4738_v10 = vrot.slane %v6721_v54, 9  ;;  %v692_v9 = vrot.slane %v690_v52, 4 }
  0x82   : > { %v1577_v29 = vsel %vm6419_vm5, %v4735_v32, %v1576_v53  ;;  %v1578_v11 = vrot.slane %v1576_v53, 4  ;;  %v4737_v32 = vrot.slane %v6702_v23, 9  ;;  %v1590_v13 = vrot.slane %v6705_v40, 5 }
  0x83   : > { %v1593_v53 = vrot.slane %v6712_v26, 5  ;;  %v6761_v3 = vcombine.low %v1584_v24, %v1587_v15  ;;  %v7786_v24 = vor.u32 %v6607_v55, %v6605_v5 }
  0x84   : > { %3234 = vmatpush1.bf16.msra.mxu0 %v5733_v34  ;;  %v1580_v34 = vsel %vm6419_vm5, %v1578_v11, %v1579_v25  ;;  %v6755_v11 = vcombine.low %v6355_v1, %v6360_v8  ;;  %v5755_v25 = vld [vmem:[%s7744_s1 + $0x344] ss:$8 sps:$4 sm:$0xff]   ;;  %v1592_v44 = vrot.slane %v1590_v13, 4  ;;  %v1597_v1 = vrot.slane %v6732_v50, 5 }
  0x85   : > { %3235 = vmatprep.subr.bf16.mxu0 %v5741_v21  ;;  %v6748_v21 = vcombine.low %v1577_v29, %v1580_v34  ;;  %v1591_v29 = vsel %vm6419_vm5, %v4737_v32, %v1590_v13  ;;  %v1600_v8 = vrot.slane %v6735_v37, 5  ;;  %v6771_v34 = vcombine.low %v6415_v58, %v6426_v63  ;;  %v5753_v58 = vld [vmem:[%s7744_s1 + $0x340] ss:$8 sps:$4 sm:$0xff]  }
  0x86   : > { %v670_v15 = vrot.slane %v7786_v24, 4  ;;  %v7787_v32 = vrot.slane %v6248_v48, 5  ;;  %v1594_v52 = vsel %vm6419_vm5, %v1592_v44, %v1593_v53  ;;  %v1598_v55 = vsel %vm6419_vm5, %v4738_v10, %v1597_v1 }
  0x87   : > { %1042 = vmatmul.mubr.bf16.gmra.mrb[40].mxu1 %v6613_v39  ;;  %2914 = vmatmul.mubr.bf16.gmra.mrb[4].mxu0 %v6506_v19  ;;  %v6787_v63 = vcombine.low %v1591_v29, %v1594_v52  ;;  %v1599_v24 = vrot.slane %v1597_v1, 4  ;;  %v696_v53 = vshll.u32 %v6691_v4, 16  ;;  %v6804_v29 = vcombine.low %v6509_v20, %v6516_v22  ;;  %v5763_v22 = vld [vmem:[%s7744_s1 + $0x354] ss:$8 sps:$4 sm:$0xff]  }
  0x88   : > { %1051 = vmatprep.mubr.bf16.mxu1 %v7784_v18  ;;  %2923 = vmatprep.mubr.bf16.mxu0 %v7784_v18  ;;  %v1522_v13 = vrot.slane %v7787_v32, 4  ;;  %v693_v44 = vor.u32 %v692_v9, %v6729_v42  ;;  %v701_v10 = vshrl.u32 %v6702_v23, 16  ;;  %v714_v20 = vshrl.u32 %v6705_v40, 16 }
  0x89   : > { %3236 = vmatpush1.bf16.msra.mxu0 %v5739_v38  ;;  %v6782_v38 = vcombine.low %v6455_v28, %v6463_v35  ;;  %v665_v28 = vsel %vm6186_vm2, %v6647_v0, %v6605_v5  ;;  %v683_v35 = vor.u32 %v6675_v2, %v6652_v51  ;;  %v675_v51 = vsel %vm6186_vm2, %v670_v15, %v6617_v27 }
  0x8a   : > { %3237 = vmatprep.subr.bf16.mxu0 %v5747_v6  ;;  %v6793_v6 = vcombine.low %v6493_v45, %v6504_v16  ;;  %v704_v45 = vshll.u32 %v6702_v23, 16  ;;  %v1601_v16 = vsel %vm6419_vm5, %v1599_v24, %v1600_v8  ;;  %v710_v5 = vshll.u32 %v6705_v40, 16 }
  0x8b   : > { %v6820_v0 = vcombine.low %v1598_v55, %v1601_v16  ;;  %v7788_v2 = vmov %v7787_v32  ;;  %v7789_v4 = vrot.slane %v6245_v47, 9  ;;  %v698_v9 = vrot.slane %v696_v53, 5  ;;  %v5761_v47 = vld [vmem:[%s7744_s1 + $0x350] ss:$8 sps:$4 sm:$0xff]   ;;  %v5771_v55 = vld [vmem:[%s7744_s1 + $0x364] ss:$8 sps:$4 sm:$0xff]  }
  0x8c   : > { %v1527_v1 = vrot.slane %v6291_v17, 5  ;;  %v6836_v8 = vcombine.low %v665_v28, %v675_v51  ;;  %v684_v15 = vrot.slane %v683_v35, 4  ;;  %v694_v48 = vrot.slane %v693_v44, 4  ;;  %v6854_v28 = vld [vmem:[%s6135_s20 + $0x3c] sm:$0xf] }
  0x8d   : > { %3238 = vmatpush1.bf16.msra.mxu0 %v5745_v49  ;;  %v1521_v27 = vsel %vm6419_vm5, %v7789_v4, %v7788_v2  ;;  %v7790_v49 = vrot.slane %v6263_v57, 5  ;;  %v6843_v57 = vcombine.low %v6569_v43, %v6579_v12  ;;  %v703_v32 = vrot.slane %v701_v10, 4  ;;  %v5769_v53 = vld [vmem:[%s7744_s1 + $0x360] ss:$8 sps:$4 sm:$0xff]   ;;  %v5779_v16 = vld [vmem:[%s7744_s1 + $0x374] ss:$8 sps:$4 sm:$0xff]  }
  0x8e   : > { %3239 = vmatprep.subr.bf16.mxu0 %v5755_v25  ;;  %v712_v52 = vrot.slane %v710_v5, 5  ;;  %v716_v17 = vrot.slane %v714_v20, 4  ;;  %v4728_v43 = vrot.slane %v6854_v28, 9  ;;  %v1529_v12 = vrot.slane %v1527_v1, 4  ;;  %v5777_v4 = vld [vmem:[%s7744_s1 + $0x370] ss:$8 sps:$4 sm:$0xff]  }
  0x8f   : > { %1052 = vmatmul.mubr.bf16.gmra.mrb[44].mxu1 %v6615_v7  ;;  %2924 = vmatmul.mubr.bf16.gmra.mrb[8].mxu0 %v6539_v62  ;;  %v1524_v25 = vsel %vm6419_vm5, %v1522_v13, %v7790_v49  ;;  %v706_v13 = vrot.slane %v704_v45, 5  ;;  %v1530_v35 = vrot.slane %v6312_v36, 5  ;;  %v699_v44 = vsel %vm6186_vm2, %v694_v48, %v698_v9 }
  0x90   : > { %1061 = vmatprep.mubr.bf16.mxu1 %v7784_v18  ;;  %2933 = vmatprep.mubr.bf16.mxu0 %v7784_v18  ;;  %v6848_v24 = vcombine.low %v1521_v27, %v1524_v25  ;;  %v717_v45 = vor.u32 %v716_v17, %v712_v52  ;;  %v725_v36 = vshrl.u32 %v6721_v54, 16  ;;  %v728_v51 = vshll.u32 %v6721_v54, 16  ;;  %v6895_v17 = vld [vmem:[%s6135_s20 + $0x48] sm:$0xf] }
  0x91   : > { %3240 = vmatpush1.bf16.msra.mxu0 %v5753_v58  ;;  %v689_v58 = vsel %vm6186_vm2, %v684_v15, %v6729_v42  ;;  %v707_v10 = vor.u32 %v706_v13, %v703_v32  ;;  %v720_v42 = vshll.u32 %v6712_v26, 16  ;;  %v734_v5 = vshll.u32 %v6732_v50, 16  ;;  %v5787_v15 = vld [vmem:[%s7744_s1 + $0x384] ss:$8 sps:$4 sm:$0xff]  }
  0x92   : > { %3241 = vmatprep.subr.bf16.mxu0 %v5763_v22  ;;  %v738_v20 = vshrl.u32 %v6732_v50, 16  ;;  %v1528_v26 = vsel %vm6419_vm5, %v4728_v43, %v1527_v1  ;;  %v1531_v22 = vsel %vm6419_vm5, %v1529_v12, %v1530_v35  ;;  %v1534_v2 = vrot.slane %v6326_v46, 5 }
  0x93   : > { %v6885_v27 = vcombine.low %v6610_v60, %v6626_v30  ;;  %v6887_v49 = vcombine.low %v689_v58, %v699_v44  ;;  %v708_v25 = vrot.slane %v707_v10, 4  ;;  %v718_v9 = vrot.slane %v717_v45, 4 }
  0x94   : > { %v722_v1 = vrot.slane %v720_v42, 5  ;;  %v727_v46 = vrot.slane %v725_v36, 4  ;;  %v730_v48 = vrot.slane %v728_v51, 5  ;;  %v740_v32 = vrot.slane %v738_v20, 4  ;;  %v6942_v20 = vld [vmem:[%s6135_s20 + $0x4] sm:$0xf] }
  0x95   : > { %3242 = vmatpush1.bf16.msra.mxu0 %v5761_v47  ;;  %v736_v47 = vrot.slane %v734_v5, 5  ;;  %v6892_v13 = vcombine.low %v1528_v26, %v1531_v22  ;;  %v4729_v60 = vrot.slane %v6895_v17, 9  ;;  %v1536_v30 = vrot.slane %v1534_v2, 4  ;;  %v6939_v5 = vld [vmem:[%s6135_s20] sm:$0xf] }
  0x96   : > { %3243 = vmatprep.subr.bf16.mxu0 %v5771_v55  ;;  %v1537_v55 = vrot.slane %v6370_v14, 5  ;;  %v713_v58 = vsel %vm6186_vm2, %v708_v25, %v712_v52  ;;  %v723_v43 = vsel %vm6186_vm2, %v718_v9, %v722_v1  ;;  %v731_v12 = vor.u32 %v730_v48, %v727_v46  ;;  %v5765_v22 = vld [vmem:[%s7744_s1 + $0x110] ss:$8 sps:$4 sm:$0xff]   ;;  %v5783_v25 = vld [vmem:[%s7744_s1 + $0x134] ss:$8 sps:$4 sm:$0xff]  }
  0x97   : > { %1062 = vmatmul.mubr.bf16.gmra.mrb[48].mxu1 %v6836_v8  ;;  %2934 = vmatmul.mubr.bf16.gmra.mrb[12].mxu0 %v6848_v24  ;;  %v741_v35 = vor.u32 %v740_v32, %v736_v47  ;;  %v1535_v14 = vsel %vm6419_vm5, %v4729_v60, %v1534_v2  ;;  %v6914_v44 = vcombine.low %v6702_v23, %v6705_v40  ;;  %v5775_v2 = vld [vmem:[%s7744_s1 + $0x124] ss:$8 sps:$4 sm:$0xff]   ;;  %v5781_v1 = vld [vmem:[%s7744_s1 + $0x130] ss:$8 sps:$4 sm:$0xff]   ;;  %v5789_v48 = vld [vmem:[%s7744_s1 + $0x140] ss:$8 sps:$4 sm:$0xff]  }
  0x98   : > { %1071 = vmatprep.mubr.bf16.mxu1 %v7784_v18  ;;  %2943 = vmatprep.mubr.bf16.mxu0 %v7784_v18  ;;  %v1538_v52 = vsel %vm6419_vm5, %v1536_v30, %v1537_v55  ;;  %v6916_v10 = vcombine.low %v713_v58, %v723_v43  ;;  %v732_v45 = vrot.slane %v731_v12, 4  ;;  %v6930_v40 = vcombine.low %v6721_v54, %v6732_v50  ;;  %v5757_v54 = vld [vmem:[%s7744_s1 + $0x100] ss:$8 sps:$4 sm:$0xff]   ;;  %v5767_v50 = vld [vmem:[%s7744_s1 + $0x114] ss:$8 sps:$4 sm:$0xff]  }
  0x99   : > { %3244 = vmatpush1.bf16.msra.mxu0 %v5769_v53  ;;  %v744_v53 = vshll.u32 %v6735_v37, 16  ;;  %v742_v42 = vrot.slane %v741_v35, 4  ;;  %v4691_v26 = vcombine.low %v6939_v5, %v6942_v20  ;;  %v7791_v9 = vld [vmem:[#allocation6_spill] sm:$0xff]  ;;  %v7793_v32 = vld [vmem:[#allocation8_spill] sm:$0xff] }
  0x9a   : > { %3245 = vmatprep.subr.bf16.mxu0 %v5779_v16  ;;  %v6918_v16 = vcombine.low %v1535_v14, %v1538_v52  ;;  %v737_v36 = vsel %vm6186_vm2, %v732_v45, %v736_v47  ;;  %v5791_v46 = vld [vmem:[%s7744_s1 + $0x144] ss:$8 sps:$4 sm:$0xff]   ;;  %v5799_v47 = vld [vmem:[%s7744_s1 + $0x154] ss:$8 sps:$4 sm:$0xff]   ;;  %v5797_v60 = vld [vmem:[%s7744_s1 + $0x150] ss:$8 sps:$4 sm:$0xff]  }
  0x9b   : > { %v746_v37 = vrot.slane %v744_v53, 5  ;;  %v5807_v30 = vld [vmem:[%s7744_s1 + $0x164] ss:$8 sps:$4 sm:$0xff]   ;;  %v5805_v55 = vld [vmem:[%s7744_s1 + $0x160] ss:$8 sps:$4 sm:$0xff]  }
  0x9c   : > { %v5814_v58 = vld [vmem:[%s7744_s1 + $0x174] ss:$8 sps:$4 sm:$0xff]   ;;  %v7794_v43 = vld [vmem:[#allocation10_spill] sm:$0xff]  ;;  %v5883_v45 = vld [vmem:[%s6135_s20 + $0x40] sm:$0xf] }
  0x9d   : > { %3246 = vmatpush1.bf16.msra.mxu0 %v5777_v4  ;;  %v747_v23 = vsel %vm6186_vm2, %v742_v42, %v746_v37  ;;  %v5773_v4 = vld [vmem:[%s7744_s1 + $0x120] ss:$8 sps:$4 sm:$0xff]   ;;  %v5812_v12 = vld [vmem:[%s7744_s1 + $0x170] ss:$8 sps:$4 sm:$0xff]   ;;  %v5820_v35 = vld [vmem:[%s7744_s1 + $0x184] ss:$8 sps:$4 sm:$0xff]   ;;  %v7019_v42 = vcombine.low %v6854_v28, %v5883_v45 }
  0x9e   : > { %3613 = vmatprep.subr.bf16.mxu0 %v5787_v15  ;;  %v6932_v51 = vcombine.low %v737_v36, %v747_v23  ;;  %v7792_v15 = vld [vmem:[#allocation17_spill] sm:$0xff]  ;;  %v5881_v53 = vld [vmem:[%s6135_s20 + $0x30] sm:$0xf]  ;;  %v5882_v14 = vld [vmem:[%s6135_s20 + $0x34] sm:$0xf] }
  0x9f   : > { %1072 = vmatmul.mubr.bf16.gmra.mrb[52].mxu1 %v6887_v49  ;;  %2944 = vmatmul.mubr.bf16.gmra.mrb[16].mxu0 %v6892_v13  ;;  %v7011_v52 = vcombine.low %v5881_v53, %v5882_v14  ;;  %v5884_v37 = vld [vmem:[%s6135_s20 + $0x4c] sm:$0xf]  ;;  %v7031_v23 = vld [vmem:[%s6135_s20 + $0xc4] sm:$0xf]  ;;  %v5821_v53 = vld [vmem:[%s7744_s1 + $0x3d0] ss:$8 sps:$4 sm:$0xff]  }
  0xa0   : > { %1081 = vmatprep.mubr.bf16.mxu1 %v7784_v18  ;;  %2953 = vmatprep.mubr.bf16.mxu0 %v7784_v18  ;;  %v7027_v36 = vcombine.low %v6895_v17, %v5884_v37  ;;  %v2765_v28 = vrot.slane %v7031_v23, 5  ;;  %v5829_v14 = vld [vmem:[%s7744_s1 + $0x3e4] ss:$8 sps:$4 sm:$0xff]   ;;  %v5827_v45 = vld [vmem:[%s7744_s1 + $0x3e0] ss:$8 sps:$4 sm:$0xff]  }
  0xa1   : > { %v5836_v37 = vld [vmem:[%s7744_s1 + $0x3f4] ss:$8 sps:$4 sm:$0xff]  }
  0xa2   : > { %v2767_v17 = vrot.slane %v2765_v28, 4 }
  0xa7   : > { %1082 = vmatmul.mubr.bf16.gmra.mrb[56].mxu1 %v6916_v10  ;;  %2954 = vmatmul.mubr.bf16.gmra.mrb[20].mxu0 %v6918_v16 }
  0xa8   : > { %1091 = vmatprep.mubr.bf16.mxu1 %v7784_v18  ;;  %2963 = vmatprep.mubr.bf16.mxu0 %v7784_v18 }
  0xaf   : > { %1092 = vmatmul.mubr.bf16.gmra.mrb[60].mxu1 %v6932_v51  ;;  %2964 = vmatmul.mubr.bf16.gmra.mrb[24].mxu0 %v6659_v33 }
  0xb0   : > { %1310 = vmatprep.mubr.bf16.mxu1 %v7784_v18  ;;  %2973 = vmatprep.mubr.bf16.mxu0 %v7784_v18 }
  0xb7   : > { %1311 = vmatmul.mubr.bf16.vlgmr.msra.gmra.mrb[0].mxu1 %v4691_v26  ;;  %2974 = vmatmul.mubr.bf16.gmra.mrb[28].mxu0 %v6669_v61  ;;  %v7038_v26 = vld [vmem:[%s6135_s20 + $0xc0] sm:$0xf] }
  0xb8   : > { %1320 = vmatprep.mubr.bf16.mxu1 %v7784_v18  ;;  %1764 = vmatpush1.bf16.msra.mxu1 %v5757_v54  ;;  %v7041_v54 = vld [vmem:[%s6135_s20 + $0xc8] sm:$0x1] }
  0xb9   : > { %1765 = vmatprep.subr.bf16.mxu1 %v5767_v50  ;;  %2983 = vmatprep.mubr.bf16.mxu0 %v7784_v18  ;;  %v4853_v50 = vrot.slane %v7038_v26, 9 }
  0xbc   : > { %1766 = vmatpush1.bf16.msra.mxu1 %v5765_v22  ;;  %v2768_v22 = vrot.slane %v7041_v54, 5 }
  0xbd   : > { %1767 = vmatprep.subr.bf16.mxu1 %v5775_v2  ;;  %v2766_v2 = vsel %vm6419_vm5, %v4853_v50, %v2765_v28  ;;  %v5834_v28 = vld [vmem:[%s7744_s1 + $0x3f0] ss:$8 sps:$4 sm:$0xff]   ;;  %v5843_v50 = vld [vmem:[%s7744_s1 + $0x404] ss:$8 sps:$4 sm:$0xff]  }
  0xbf   : > { %1321 = vmatmul.mubr.bf16.gmra.mrb[4].mxu1 %v7791_v9  ;;  %2984 = vmatmul.mubr.bf16.gmra.mrb[32].mxu0 %v7792_v15 }
  0xc0   : > { %1330 = vmatprep.mubr.bf16.mxu1 %v7784_v18  ;;  %1768 = vmatpush1.bf16.msra.mxu1 %v5773_v4  ;;  %v2769_v4 = vsel %vm6419_vm5, %v2767_v17, %v2768_v22  ;;  %v1492_v17 = vrot.slane %v6942_v20, 5  ;;  %v5885_v22 = vld [vmem:[%s6135_s20 + $0x8] sm:$0x1] }
  0xc1   : > { %1769 = vmatprep.subr.bf16.mxu1 %v5783_v25  ;;  %2993 = vmatprep.mubr.bf16.mxu0 %v7784_v18  ;;  %v7053_v25 = vcombine.low %v2766_v2, %v2769_v4  ;;  %v1495_v2 = vrot.slane %v5885_v22, 5  ;;  %v4723_v4 = vrot.slane %v6939_v5, 9  ;;  %v5818_v5 = vld [vmem:[%s7744_s1 + $0x180] ss:$8 sps:$4 sm:$0xff]   ;;  %v5862_v22 = vld [vmem:[%s7744_s1 + $0x1f0] ss:$8 sps:$4 sm:$0xff]  }
  0xc4   : > { %1770 = vmatpush1.bf16.msra.mxu1 %v5781_v1  ;;  %v5785_v1 = vld [vmem:[%s7744_s1 + $0x380] ss:$8 sps:$4 sm:$0xff]  }
  0xc5   : > { %1771 = vmatprep.subr.bf16.mxu1 %v5791_v46  ;;  %v5795_v46 = vld [vmem:[%s7744_s1 + $0x394] ss:$8 sps:$4 sm:$0xff]  }
  0xc7   : > { %1331 = vmatmul.mubr.bf16.gmra.mrb[8].mxu1 %v7793_v32  ;;  %2994 = vmatmul.mubr.bf16.gmra.mrb[36].mxu0 %v6714_v41 }
  0xc8   : > { %1340 = vmatprep.mubr.bf16.mxu1 %v7784_v18  ;;  %1772 = vmatpush1.bf16.msra.mxu1 %v5789_v48  ;;  %v5793_v48 = vld [vmem:[%s7744_s1 + $0x390] ss:$8 sps:$4 sm:$0xff]  }
  0xc9   : > { %1773 = vmatprep.subr.bf16.mxu1 %v5799_v47  ;;  %3003 = vmatprep.mubr.bf16.mxu0 %v7784_v18  ;;  %v5803_v47 = vld [vmem:[%s7744_s1 + $0x3a4] ss:$8 sps:$4 sm:$0xff]  }
  0xcc   : > { %1774 = vmatpush1.bf16.msra.mxu1 %v5797_v60  ;;  %v5801_v60 = vld [vmem:[%s7744_s1 + $0x3a0] ss:$8 sps:$4 sm:$0xff]  }
  0xcd   : > { %1775 = vmatprep.subr.bf16.mxu1 %v5807_v30  ;;  %v5811_v30 = vld [vmem:[%s7744_s1 + $0x3b4] ss:$8 sps:$4 sm:$0xff]  }
  0xcf   : > { %1341 = vmatmul.mubr.bf16.gmra.mrb[12].mxu1 %v7794_v43  ;;  %3004 = vmatmul.mubr.bf16.gmra.mrb[40].mxu0 %v6723_v31 }
  0xd0   : > { %1350 = vmatprep.mubr.bf16.mxu1 %v7784_v18  ;;  %1776 = vmatpush1.bf16.msra.mxu1 %v5805_v55  ;;  %v5809_v55 = vld [vmem:[%s7744_s1 + $0x3b0] ss:$8 sps:$4 sm:$0xff]  }
  0xd1   : > { %1777 = vmatprep.subr.bf16.mxu1 %v5814_v58  ;;  %3013 = vmatprep.mubr.bf16.mxu0 %v7784_v18  ;;  %v5817_v58 = vld [vmem:[%s7744_s1 + $0x3c4] ss:$8 sps:$4 sm:$0xff]  }
  0xd4   : > { %1778 = vmatpush1.bf16.msra.mxu1 %v5812_v12  ;;  %v5815_v12 = vld [vmem:[%s7744_s1 + $0x3c0] ss:$8 sps:$4 sm:$0xff]  }
  0xd5   : > { %2123 = vmatprep.subr.bf16.mxu1 %v5820_v35  ;;  %v5823_v35 = vld [vmem:[%s7744_s1 + $0x3d4] ss:$8 sps:$4 sm:$0xff]  }
  0xd7   : > { %1351 = vmatmul.mubr.bf16.gmra.mrb[16].mxu1 %v7011_v52  ;;  %3014 = vmatmul.mubr.bf16.gmra.mrb[44].mxu0 %v6748_v21 }
  0xd8   : > { %1360 = vmatprep.mubr.bf16.mxu1 %v7784_v18  ;;  %3023 = vmatprep.mubr.bf16.mxu0 %v7784_v18 }
  0xdf   : > { %1361 = vmatmul.mubr.bf16.gmra.mrb[20].mxu1 %v7019_v42  ;;  %3024 = vmatmul.mubr.bf16.gmra.mrb[48].mxu0 %v6761_v3 }
  0xe0   : > { %1370 = vmatprep.mubr.bf16.mxu1 %v7784_v18  ;;  %3033 = vmatprep.mubr.bf16.mxu0 %v7784_v18 }
  0xe7   : > { %1371 = vmatmul.mubr.bf16.gmra.mrb[24].mxu1 %v7027_v36  ;;  %3034 = vmatmul.mubr.bf16.gmra.mrb[52].mxu0 %v6787_v63 }
  0xe8   : > { %1380 = vmatprep.mubr.bf16.mxu1 %v7784_v18  ;;  %3043 = vmatprep.mubr.bf16.mxu0 %v7784_v18 }
  0xef   : > { %1381 = vmatmul.mubr.bf16.gmra.mrb[28].mxu1 %v6755_v11  ;;  %3044 = vmatmul.mubr.bf16.gmra.mrb[56].mxu0 %v6820_v0 }
  0xf0   : > { %1390 = vmatprep.mubr.bf16.mxu1 %v7784_v18  ;;  %3053 = vmatprep.mubr.bf16.mxu0 %v7784_v18 }
  0xf7   : > { %1391 = vmatmul.mubr.bf16.gmra.mrb[32].mxu1 %v6771_v34  ;;  %3054 = vmatmul.mubr.bf16.gmra.mrb[60].mxu0 %v7053_v25 }
  0xf8   : > { %1400 = vmatprep.mubr.bf16.mxu1 %v7784_v18  ;;  %3263 = vmatprep.mubr.bf16.mxu0 %v7784_v18 }
  0xff   : > { %1401 = vmatmul.mubr.bf16.gmra.mrb[36].mxu1 %v6782_v38  ;;  %3264 = vmatmul.mubr.bf16.vlgmr.msra.gmra.mrb[0].mxu0 %v7793_v32 }
 0x100   : > { %1410 = vmatprep.mubr.bf16.mxu1 %v7784_v18  ;;  %3614 = vmatpush1.bf16.msra.mxu0 %v5785_v1  ;;  %v1494_v1 = vrot.slane %v1492_v17, 4 }
 0x101   : > { %3273 = vmatprep.mubr.bf16.mxu0 %v7784_v18  ;;  %3615 = vmatprep.subr.bf16.mxu0 %v5795_v46  ;;  %v1493_v46 = vsel %vm6419_vm5, %v4723_v4, %v1492_v17  ;;  %v5864_v17 = vld [vmem:[%s7744_s1 + $0x1f4] ss:$8 sps:$4 sm:$0xff]   ;;  %v7219_v4 = vcombine.low %v7038_v26, %v7031_v23 }
 0x104   : > { %3616 = vmatpush1.bf16.msra.mxu0 %v5793_v48  ;;  %v1496_v48 = vsel %vm6419_vm5, %v1494_v1, %v1495_v2  ;;  %v5886_v2 = vld [vmem:[%s7744_s1 + $0x204] ss:$8 sps:$4 sm:$0xff]  }
 0x105   : > { %3617 = vmatprep.subr.bf16.mxu0 %v5803_v47  ;;  %v4755_v20 = vcombine.low %v1493_v46, %v1496_v48  ;;  %v5826_v47 = vld [vmem:[%s7744_s1 + $0x194] ss:$8 sps:$4 sm:$0xff]   ;;  %v7226_v1 = vld [vmem:[%s6135_s20 + $0xcc] sm:$0xf]  ;;  %v7229_v46 = vld [vmem:[%s6135_s20 + $0xd0] sm:$0xf] }
 0x106   : > { %v4903_v48 = vcombine.low %v7226_v1, %v7229_v46  ;;  %v3873_v56 = vrot.slane %v7229_v46, 5 }
 0x107   : > { %1411 = vmatmul.mubr.bf16.gmra.mrb[40].mxu1 %v6793_v6  ;;  %3274 = vmatmul.mubr.bf16.gmra.mrb[4].mxu0 %v7794_v43 }
 0x108   : > { %1420 = vmatprep.mubr.bf16.mxu1 %v7784_v18  ;;  %3283 = vmatprep.mubr.bf16.mxu0 %v7784_v18 }
 0x109   : > { %3618 = vmatpush1.bf16.msra.mxu0 %v5801_v60  ;;  %v5824_v60 = vld [vmem:[%s7744_s1 + $0x190] ss:$8 sps:$4 sm:$0xff]  }
 0x10a   : > { %3619 = vmatprep.subr.bf16.mxu0 %v5811_v30  ;;  %v5832_v30 = vld [vmem:[%s7744_s1 + $0x1a4] ss:$8 sps:$4 sm:$0xff]  }
 0x10d   : > { %3620 = vmatpush1.bf16.msra.mxu0 %v5809_v55  ;;  %v5830_v55 = vld [vmem:[%s7744_s1 + $0x1a0] ss:$8 sps:$4 sm:$0xff]  }
 0x10e   : > { %3621 = vmatprep.subr.bf16.mxu0 %v5817_v58  ;;  %v5839_v58 = vld [vmem:[%s7744_s1 + $0x1b4] ss:$8 sps:$4 sm:$0xff]  }
 0x10f   : > { %1421 = vmatmul.mubr.bf16.gmra.mrb[44].mxu1 %v6804_v29  ;;  %3284 = vmatmul.mubr.bf16.gmra.mrb[8].mxu0 %v7011_v52 }
 0x110   : > { %1430 = vmatprep.mubr.bf16.mxu1 %v7784_v18  ;;  %3293 = vmatprep.mubr.bf16.mxu0 %v7784_v18 }
 0x111   : > { %3622 = vmatpush1.bf16.msra.mxu0 %v5815_v12  ;;  %v7795_v12 = vld [vmem:[#allocation12_spill] sm:$0xff] }
 0x112   : > { %3623 = vmatprep.subr.bf16.mxu0 %v5823_v35  ;;  %v5837_v35 = vld [vmem:[%s7744_s1 + $0x1b0] ss:$8 sps:$4 sm:$0xff]  }
 0x115   : > { %3624 = vmatpush1.bf16.msra.mxu0 %v5821_v53  ;;  %v5846_v53 = vld [vmem:[%s7744_s1 + $0x1c4] ss:$8 sps:$4 sm:$0xff]  }
 0x116   : > { %3625 = vmatprep.subr.bf16.mxu0 %v5829_v14  ;;  %v5844_v14 = vld [vmem:[%s7744_s1 + $0x1c0] ss:$8 sps:$4 sm:$0xff]  }
 0x117   : > { %1431 = vmatmul.mubr.bf16.gmra.mrb[48].mxu1 %v6843_v57  ;;  %3294 = vmatmul.mubr.bf16.gmra.mrb[12].mxu0 %v7019_v42 }
 0x118   : > { %1440 = vmatprep.mubr.bf16.mxu1 %v7784_v18  ;;  %3303 = vmatprep.mubr.bf16.mxu0 %v7784_v18 }
 0x119   : > { %3626 = vmatpush1.bf16.msra.mxu0 %v5827_v45  ;;  %v5852_v45 = vld [vmem:[%s7744_s1 + $0x1d4] ss:$8 sps:$4 sm:$0xff]  }
 0x11a   : > { %3627 = vmatprep.subr.bf16.mxu0 %v5836_v37  ;;  %v5850_v37 = vld [vmem:[%s7744_s1 + $0x1d0] ss:$8 sps:$4 sm:$0xff]  }
 0x11d   : > { %3628 = vmatpush1.bf16.msra.mxu0 %v5834_v28  ;;  %v5858_v28 = vld [vmem:[%s7744_s1 + $0x1e4] ss:$8 sps:$4 sm:$0xff]  }
 0x11e   : > { %3979 = vmatprep.subr.bf16.mxu0 %v5843_v50  ;;  %v5856_v50 = vld [vmem:[%s7744_s1 + $0x1e0] ss:$8 sps:$4 sm:$0xff]  }
 0x11f   : > { %1441 = vmatmul.mubr.bf16.gmra.mrb[52].mxu1 %v6885_v27  ;;  %3304 = vmatmul.mubr.bf16.gmra.mrb[16].mxu0 %v7027_v36 }
 0x120   : > { %1450 = vmatprep.mubr.bf16.mxu1 %v7784_v18  ;;  %3313 = vmatprep.mubr.bf16.mxu0 %v7784_v18 }
 0x127   : > { %1451 = vmatmul.mubr.bf16.gmra.mrb[56].mxu1 %v6914_v44  ;;  %3314 = vmatmul.mubr.bf16.gmra.mrb[20].mxu0 %v6755_v11 }
 0x128   : > { %1460 = vmatprep.mubr.bf16.mxu1 %v7784_v18  ;;  %3323 = vmatprep.mubr.bf16.mxu0 %v7784_v18 }
 0x12f   : > { %1461 = vmatmul.mubr.bf16.gmra.mrb[60].mxu1 %v6930_v40  ;;  %3324 = vmatmul.mubr.bf16.gmra.mrb[24].mxu0 %v6771_v34 }
 0x130   : > { %1795 = vmatprep.mubr.bf16.mxu1 %v7784_v18  ;;  %3333 = vmatprep.mubr.bf16.mxu0 %v7784_v18 }
 0x137   : > { %1796 = vmatmul.mubr.bf16.vlgmr.msra.gmra.mrb[0].mxu1 %v4755_v20  ;;  %3334 = vmatmul.mubr.bf16.gmra.mrb[28].mxu0 %v6782_v38  ;;  %v5841_v20 = vld [vmem:[%s7744_s1 + $0x400] ss:$8 sps:$4 sm:$0xff]  }
 0x138   : > { %1805 = vmatprep.mubr.bf16.mxu1 %v7784_v18  ;;  %2124 = vmatpush1.bf16.msra.mxu1 %v5818_v5  ;;  %v5849_v5 = vld [vmem:[%s7744_s1 + $0x414] ss:$8 sps:$4 sm:$0xff]  }
 0x139   : > { %2125 = vmatprep.subr.bf16.mxu1 %v5826_v47  ;;  %3343 = vmatprep.mubr.bf16.mxu0 %v7784_v18  ;;  %v7796_v47 = vld [vmem:[#allocation5_spill] sm:$0xff] }
 0x13c   : > { %2126 = vmatpush1.bf16.msra.mxu1 %v5824_v60  ;;  %v5847_v60 = vld [vmem:[%s7744_s1 + $0x410] ss:$8 sps:$4 sm:$0xff]  }
 0x13d   : > { %2127 = vmatprep.subr.bf16.mxu1 %v5832_v30  ;;  %v5855_v30 = vld [vmem:[%s7744_s1 + $0x424] ss:$8 sps:$4 sm:$0xff]  }
 0x13f   : > { %1806 = vmatmul.mubr.bf16.gmra.mrb[4].mxu1 %v7795_v12  ;;  %3344 = vmatmul.mubr.bf16.gmra.mrb[32].mxu0 %v6793_v6  ;;  %v7797_v12 = vld [vmem:[#allocation7_spill] sm:$0xff] }
 0x140   : > { %1815 = vmatprep.mubr.bf16.mxu1 %v7784_v18  ;;  %2128 = vmatpush1.bf16.msra.mxu1 %v5830_v55  ;;  %v5853_v55 = vld [vmem:[%s7744_s1 + $0x420] ss:$8 sps:$4 sm:$0xff]  }
 0x141   : > { %2129 = vmatprep.subr.bf16.mxu1 %v5839_v58  ;;  %3353 = vmatprep.mubr.bf16.mxu0 %v7784_v18  ;;  %v5861_v58 = vld [vmem:[%s7744_s1 + $0x434] ss:$8 sps:$4 sm:$0xff]  }
 0x144   : > { %2130 = vmatpush1.bf16.msra.mxu1 %v5837_v35  ;;  %v5859_v35 = vld [vmem:[%s7744_s1 + $0x430] ss:$8 sps:$4 sm:$0xff]  }
 0x145   : > { %2131 = vmatprep.subr.bf16.mxu1 %v5846_v53  ;;  %v5867_v53 = vld [vmem:[%s7744_s1 + $0x444] ss:$8 sps:$4 sm:$0xff]  }
 0x147   : > { %1816 = vmatmul.mubr.bf16.gmra.mrb[8].mxu1 %v6506_v19  ;;  %3354 = vmatmul.mubr.bf16.gmra.mrb[36].mxu0 %v6804_v29 }
 0x148   : > { %1825 = vmatprep.mubr.bf16.mxu1 %v7784_v18  ;;  %2132 = vmatpush1.bf16.msra.mxu1 %v5844_v14  ;;  %v5865_v14 = vld [vmem:[%s7744_s1 + $0x440] ss:$8 sps:$4 sm:$0xff]  }
 0x149   : > { %2133 = vmatprep.subr.bf16.mxu1 %v5852_v45  ;;  %3363 = vmatprep.mubr.bf16.mxu0 %v7784_v18  ;;  %v5870_v45 = vld [vmem:[%s7744_s1 + $0x454] ss:$8 sps:$4 sm:$0xff]  }
 0x14c   : > { %2134 = vmatpush1.bf16.msra.mxu1 %v5850_v37  ;;  %v7798_v37 = vld [vmem:[#allocation9_spill] sm:$0xff] }
 0x14d   : > { %2135 = vmatprep.subr.bf16.mxu1 %v5858_v28  ;;  %v5868_v28 = vld [vmem:[%s7744_s1 + $0x450] ss:$8 sps:$4 sm:$0xff]  }
 0x14f   : > { %1826 = vmatmul.mubr.bf16.gmra.mrb[12].mxu1 %v6539_v62  ;;  %3364 = vmatmul.mubr.bf16.gmra.mrb[40].mxu0 %v6843_v57 }
 0x150   : > { %1835 = vmatprep.mubr.bf16.mxu1 %v7784_v18  ;;  %2136 = vmatpush1.bf16.msra.mxu1 %v5856_v50  ;;  %v5873_v50 = vld [vmem:[%s7744_s1 + $0x464] ss:$8 sps:$4 sm:$0xff]  }
 0x151   : > { %2137 = vmatprep.subr.bf16.mxu1 %v5864_v17  ;;  %3373 = vmatprep.mubr.bf16.mxu0 %v7784_v18  ;;  %v5871_v17 = vld [vmem:[%s7744_s1 + $0x460] ss:$8 sps:$4 sm:$0xff]  }
 0x154   : > { %2138 = vmatpush1.bf16.msra.mxu1 %v5862_v22  ;;  %v5876_v22 = vld [vmem:[%s7744_s1 + $0x474] ss:$8 sps:$4 sm:$0xff]  }
 0x155   : > { %5071 = vmatprep.subr.bf16.mxu1 %v5886_v2  ;;  %v7799_v2 = vld [vmem:[#allocation11_spill] sm:$0xff] }
 0x157   : > { %1836 = vmatmul.mubr.bf16.gmra.mrb[16].mxu1 %v6848_v24  ;;  %3374 = vmatmul.mubr.bf16.gmra.mrb[44].mxu0 %v6885_v27 }
 0x158   : > { %1845 = vmatprep.mubr.bf16.mxu1 %v7784_v18  ;;  %3383 = vmatprep.mubr.bf16.mxu0 %v7784_v18 }
 0x15f   : > { %1846 = vmatmul.mubr.bf16.gmra.mrb[20].mxu1 %v6892_v13  ;;  %3384 = vmatmul.mubr.bf16.gmra.mrb[48].mxu0 %v6914_v44 }
 0x160   : > { %1855 = vmatprep.mubr.bf16.mxu1 %v7784_v18  ;;  %3393 = vmatprep.mubr.bf16.mxu0 %v7784_v18 }
 0x167   : > { %1856 = vmatmul.mubr.bf16.gmra.mrb[24].mxu1 %v6918_v16  ;;  %3394 = vmatmul.mubr.bf16.gmra.mrb[52].mxu0 %v6930_v40 }
 0x168   : > { %1865 = vmatprep.mubr.bf16.mxu1 %v7784_v18  ;;  %3403 = vmatprep.mubr.bf16.mxu0 %v7784_v18 }
 0x16f   : > { %1866 = vmatmul.mubr.bf16.gmra.mrb[28].mxu1 %v6659_v33  ;;  %3404 = vmatmul.mubr.bf16.gmra.mrb[56].mxu0 %v7219_v4 }
 0x170   : > { %1875 = vmatprep.mubr.bf16.mxu1 %v7784_v18  ;;  %3413 = vmatprep.mubr.bf16.mxu0 %v7784_v18 }
 0x177   : > { %1876 = vmatmul.mubr.bf16.gmra.mrb[32].mxu1 %v6669_v61  ;;  %3414 = vmatmul.mubr.bf16.gmra.mrb[60].mxu0 %v4903_v48  ;;  %v5874_v48 = vld [vmem:[%s7744_s1 + $0x470] ss:$8 sps:$4 sm:$0xff]  }
 0x178   : > { %1885 = vmatprep.mubr.bf16.mxu1 %v7784_v18  ;;  %3645 = vmatprep.mubr.bf16.mxu0 %v7784_v18 }
 0x17f   : > { %1886 = vmatmul.mubr.bf16.gmra.mrb[36].mxu1 %v7792_v15  ;;  %3646 = vmatmul.mubr.bf16.vlgmr.msra.gmra.mrb[0].mxu0 %v7796_v47  ;;  %v7802_v47 = vld [vmem:[#allocation15_spill] sm:$0xff] }
 0x180   : > { %1895 = vmatprep.mubr.bf16.mxu1 %v7784_v18  ;;  %3980 = vmatpush1.bf16.msra.mxu0 %v5841_v20  ;;  %v7800_v20 = vld [vmem:[#allocation13_spill] sm:$0xff] }
 0x181   : > { %3655 = vmatprep.mubr.bf16.mxu0 %v7784_v18  ;;  %3981 = vmatprep.subr.bf16.mxu0 %v5849_v5  ;;  %v7801_v5 = vld [vmem:[#allocation14_spill] sm:$0xff] }
 0x184   : > { %3982 = vmatpush1.bf16.msra.mxu0 %v5847_v60  ;;  %v5887_v60 = vld [vmem:[%s7744_s1 + $0x200] ss:$8 sps:$4 sm:$0xff]  }
 0x185   : > { %3983 = vmatprep.subr.bf16.mxu0 %v5855_v30  ;;  %v7803_v30 = vld [vmem:[#allocation16_spill] sm:$0xff] }
 0x187   : > { %1896 = vmatmul.mubr.bf16.gmra.mrb[40].mxu1 %v6714_v41  ;;  %3656 = vmatmul.mubr.bf16.gmra.mrb[4].mxu0 %v7797_v12  ;;  %v5891_v12 = vld [vmem:[%s7744_s1 + $0x220] ss:$8 sps:$4 sm:$0xff]  }
 0x188   : > { %1905 = vmatprep.mubr.bf16.mxu1 %v7784_v18  ;;  %3665 = vmatprep.mubr.bf16.mxu0 %v7784_v18 }
 0x189   : > { %3984 = vmatpush1.bf16.msra.mxu0 %v5853_v55  ;;  %v5888_v55 = vld [vmem:[%s7744_s1 + $0x214] ss:$8 sps:$4 sm:$0xff]  }
 0x18a   : > { %3985 = vmatprep.subr.bf16.mxu0 %v5861_v58  ;;  %v5890_v58 = vld [vmem:[%s7744_s1 + $0x224] ss:$8 sps:$4 sm:$0xff]  }
 0x18d   : > { %3986 = vmatpush1.bf16.msra.mxu0 %v5859_v35  ;;  %v5892_v35 = vld [vmem:[%s7744_s1 + $0x234] ss:$8 sps:$4 sm:$0xff]  }
 0x18e   : > { %3987 = vmatprep.subr.bf16.mxu0 %v5867_v53  ;;  %v5894_v53 = vld [vmem:[%s7744_s1 + $0x244] ss:$8 sps:$4 sm:$0xff]  }
 0x18f   : > { %1906 = vmatmul.mubr.bf16.gmra.mrb[44].mxu1 %v6723_v31  ;;  %3666 = vmatmul.mubr.bf16.gmra.mrb[8].mxu0 %v7798_v37  ;;  %v5898_v37 = vld [vmem:[%s7744_s1 + $0x264] ss:$8 sps:$4 sm:$0xff]  }
 0x190   : > { %1915 = vmatprep.mubr.bf16.mxu1 %v7784_v18  ;;  %3675 = vmatprep.mubr.bf16.mxu0 %v7784_v18 }
 0x191   : > { %3988 = vmatpush1.bf16.msra.mxu0 %v5865_v14  ;;  %v5895_v14 = vld [vmem:[%s7744_s1 + $0x240] ss:$8 sps:$4 sm:$0xff]  }
 0x192   : > { %3989 = vmatprep.subr.bf16.mxu0 %v5870_v45  ;;  %v5896_v45 = vld [vmem:[%s7744_s1 + $0x254] ss:$8 sps:$4 sm:$0xff]  }
 0x195   : > { %3990 = vmatpush1.bf16.msra.mxu0 %v5868_v28  ;;  %v5899_v28 = vld [vmem:[%s7744_s1 + $0x260] ss:$8 sps:$4 sm:$0xff]  }
 0x196   : > { %3991 = vmatprep.subr.bf16.mxu0 %v5873_v50  ;;  %v5900_v50 = vld [vmem:[%s7744_s1 + $0x274] ss:$8 sps:$4 sm:$0xff]  }
 0x197   : > { %1916 = vmatmul.mubr.bf16.gmra.mrb[48].mxu1 %v6748_v21  ;;  %3676 = vmatmul.mubr.bf16.gmra.mrb[12].mxu0 %v7799_v2  ;;  %v2390_v2 = vshll.u32 %v7031_v23, 16 }
 0x198   : > { %1925 = vmatprep.mubr.bf16.mxu1 %v7784_v18  ;;  %3685 = vmatprep.mubr.bf16.mxu0 %v7784_v18 }
 0x199   : > { %3992 = vmatpush1.bf16.msra.mxu0 %v5871_v17  ;;  %v2381_v17 = vshrl.u32 %v7038_v26, 16 }
 0x19a   : > { %3993 = vmatprep.subr.bf16.mxu0 %v5876_v22  ;;  %v2384_v22 = vshll.u32 %v7038_v26, 16  ;;  %v2400_v26 = vshll.u32 %v7041_v54, 16  ;;  %v7389_v54 = vld [vmem:[%s6135_s20 + $0xd4] sm:$0x1]  ;;  %s4574_s20 = sshll.u32 %s281_s19, 4  ;;  %s7703_s20 = int_to_ptr.vmem [resolvable:$true] %s4574_s20 }
 0x19b   : > { %s5902_s8 = scalar_lea.vmem %s7703_s20, 16  ;;  %p5909_p0 = scmp.lt.s32.totalorder %s7703_s20, %s5907_s14 }
 0x19c   : > { %p5903_p11 = scmp.ne.s32.totalorder %s7703_s20, %s5902_s8  ;;  %p5910_p1 = scmp.lt.s32.totalorder %s5908_s22, %s5902_s8 }
 0x19d   : > { %3994 = vmatpush1.bf16.msra.mxu0 %v5874_v48  ;;  %v2394_v48 = vshrl.u32 %v7031_v23, 16  ;;  %v3492_v23 = vshll.u32 %v7226_v1, 16 }
 0x19e   : > { %p5904_p12 = pnand %p5903_p11, %p6049_p5  ;;  %p5911_p2 = por %p5910_p1, %p5909_p0 }
 0x19f   : > { %1926 = vmatmul.mubr.bf16.gmra.mrb[52].mxu1 %v6761_v3  ;;  %3686 = vmatmul.mubr.bf16.gmra.mrb[16].mxu0 %v7800_v20  ;;  %v2383_v20 = vrot.slane %v2381_v17, 4 }
 0x1a0   : > { %1935 = vmatprep.mubr.bf16.mxu1 %v7784_v18  ;;  %3695 = vmatprep.mubr.bf16.mxu0 %v7784_v18  ;;  %p5905_p13 = pneg %p5904_p12 }
 0x1a2   : > { %p5912_p3 = pnand %p5911_p2, %p5905_p13 }
 0x1a7   : > { %1936 = vmatmul.mubr.bf16.gmra.mrb[56].mxu1 %v6787_v63  ;;  %3696 = vmatmul.mubr.bf16.gmra.mrb[20].mxu0 %v7801_v5  ;;  %v2386_v5 = vrot.slane %v2384_v22, 5 }
 0x1a8   : > { %1945 = vmatprep.mubr.bf16.mxu1 %v7784_v18  ;;  %3705 = vmatprep.mubr.bf16.mxu0 %v7784_v18 }
 0x1af   : > { %1946 = vmatmul.mubr.bf16.gmra.mrb[60].mxu1 %v6820_v0  ;;  %3706 = vmatmul.mubr.bf16.gmra.mrb[24].mxu0 %v7802_v47  ;;  %v2392_v47 = vrot.slane %v2390_v2, 5 }
 0x1b0   : > { %2155 = vmatprep.mubr.bf16.mxu1 %v7784_v18  ;;  %3715 = vmatprep.mubr.bf16.mxu0 %v7784_v18 }
 0x1b7   : > { %2156 = vmatmul.mubr.bf16.vlgmr.msra.gmra.mrb[0].mxu1 %v7791_v9  ;;  %3716 = vmatmul.mubr.bf16.gmra.mrb[28].mxu0 %v7803_v30  ;;  %v5889_v9 = vld [vmem:[%s7744_s1 + $0x210] ss:$8 sps:$4 sm:$0xff]  }
 0x1b8   : > { %2165 = vmatprep.mubr.bf16.mxu1 %v7784_v18  ;;  %5079 = vmatpush1.bf16.msra.mxu1 %v5887_v60  ;;  %v2396_v60 = vrot.slane %v2394_v48, 4 }
 0x1b9   : > { %5072 = vmatprep.subr.bf16.mxu1 %v5888_v55  ;;  %3725 = vmatprep.mubr.bf16.mxu0 %v7784_v18  ;;  %v3489_v55 = vshrl.u32 %v7226_v1, 16 }
 0x1ba   : > { %v2397_v30 = vor.u32 %v2396_v60, %v2392_v47 }
 0x1bc   : > { %5080 = vmatpush1.bf16.msra.mxu1 %v5889_v9  ;;  %v3502_v9 = vshrl.u32 %v7229_v46, 16 }
 0x1bd   : > { %5073 = vmatprep.subr.bf16.mxu1 %v5890_v58  ;;  %v3498_v58 = vshll.u32 %v7229_v46, 16 }
 0x1bf   : > { %2166 = vmatmul.mubr.bf16.gmra.mrb[4].mxu1 %v7793_v32  ;;  %3726 = vmatmul.mubr.bf16.gmra.mrb[32].mxu0 %v6613_v39  ;;  %v5893_v32 = vld [vmem:[%s7744_s1 + $0x230] ss:$8 sps:$4 sm:$0xff]  }
 0x1c0   : > { %2175 = vmatprep.mubr.bf16.mxu1 %v7784_v18  ;;  %5081 = vmatpush1.bf16.msra.mxu1 %v5891_v12  ;;  %v2398_v12 = vrot.slane %v2397_v30, 4  ;;  %v4396_v30 = vld [vmem:[%s7745_s2 + $0x98] sm:$0xff] }
 0x1c1   : > { %5074 = vmatprep.subr.bf16.mxu1 %v5892_v35  ;;  %3735 = vmatprep.mubr.bf16.mxu0 %v7784_v18  ;;  %v2402_v35 = vrot.slane %v2400_v26, 5 }
 0x1c4   : > { %5082 = vmatpush1.bf16.msra.mxu1 %v5893_v32  ;;  %v3491_v32 = vrot.slane %v3489_v55, 4 }
 0x1c5   : > { %5075 = vmatprep.subr.bf16.mxu1 %v5894_v53  ;;  %v3494_v53 = vrot.slane %v3492_v23, 5  ;;  %v4379_v23 = vld [vmem:[%s7745_s2 + $0x10] sm:$0xff] }
 0x1c7   : > { %2176 = vmatmul.mubr.bf16.gmra.mrb[8].mxu1 %v7794_v43  ;;  %3736 = vmatmul.mubr.bf16.gmra.mrb[36].mxu0 %v6615_v7  ;;  %v5897_v43 = vld [vmem:[%s7744_s1 + $0x250] ss:$8 sps:$4 sm:$0xff]  }
 0x1c8   : > { %2185 = vmatprep.mubr.bf16.mxu1 %v7784_v18  ;;  %5083 = vmatpush1.bf16.msra.mxu1 %v5895_v14  ;;  %v3500_v14 = vrot.slane %v3498_v58, 5 }
 0x1c9   : > { %5076 = vmatprep.subr.bf16.mxu1 %v5896_v45  ;;  %3745 = vmatprep.mubr.bf16.mxu0 %v7784_v18  ;;  %v3504_v45 = vrot.slane %v3502_v9, 4  ;;  %v4380_v9 = vld [vmem:[%s7745_s2 + $0x18] sm:$0xff] }
 0x1cc   : > { %5084 = vmatpush1.bf16.msra.mxu1 %v5897_v43 }
 0x1cd   : > { %5077 = vmatprep.subr.bf16.mxu1 %v5898_v37  ;;  %v2403_v37 = vsel %vm6186_vm2, %v2398_v12, %v2402_v35  ;;  %v4397_v35 = vld [vmem:[%s7745_s2 + $0xa0] sm:$0xff] }
 0x1cf   : > { %2186 = vmatmul.mubr.bf16.gmra.mrb[12].mxu1 %v7011_v52  ;;  %3746 = vmatmul.mubr.bf16.gmra.mrb[40].mxu0 %v6836_v8  ;;  %v5901_v52 = vld [vmem:[%s7744_s1 + $0x270] ss:$8 sps:$4 sm:$0xff]  }
 0x1d0   : > { %2195 = vmatprep.mubr.bf16.mxu1 %v7784_v18  ;;  %5085 = vmatpush1.bf16.msra.mxu1 %v5899_v28  ;;  %v3495_v28 = vor.u32 %v3494_v53, %v3491_v32  ;;  %v4398_v32 = vld [vmem:[%s7745_s2 + $0xa8] sm:$0xff] }
 0x1d1   : > { %5078 = vmatprep.subr.bf16.mxu1 %v5900_v50  ;;  %3755 = vmatprep.mubr.bf16.mxu0 %v7784_v18  ;;  %v3505_v50 = vor.u32 %v3504_v45, %v3500_v14  ;;  %v4381_v45 = vld [vmem:[%s7745_s2 + $0x20] sm:$0xff] }
 0x1d3   : > { %v3506_v22 = vrot.slane %v3505_v50, 4 }
 0x1d4   : > { %5086 = vmatpush1.bf16.msra.mxu1 %v5901_v52  ;;  %v3508_v52 = vshll.u32 %v7389_v54, 16 }
 0x1d6   : > { %v3510_v2 = vrot.slane %v3508_v52, 5  ;;  %v4399_v52 = vld [vmem:[%s7745_s2 + $0xb0] sm:$0xff] }
 0x1d7   : > { %2196 = vmatmul.mubr.bf16.gmra.mrb[16].mxu1 %v7019_v42  ;;  %3756 = vmatmul.mubr.bf16.gmra.mrb[44].mxu0 %v6887_v49  ;;  %v2387_v42 = vor.u32 %v2386_v5, %v2383_v20 }
 0x1d8   : > { %2205 = vmatprep.mubr.bf16.mxu1 %v7784_v18  ;;  %3765 = vmatprep.mubr.bf16.mxu0 %v7784_v18  ;;  %v3511_v20 = vsel %vm6186_vm2, %v3506_v22, %v3510_v2 }
 0x1df   : > { %2206 = vmatmul.mubr.bf16.gmra.mrb[20].mxu1 %v7027_v36  ;;  %3766 = vmatmul.mubr.bf16.gmra.mrb[48].mxu0 %v6916_v10  ;;  %v2388_v36 = vrot.slane %v2387_v42, 4  ;;  %v4395_v42 = vld [vmem:[%s7745_s2 + $0x90] sm:$0xff] }
 0x1e0   : > { %2215 = vmatprep.mubr.bf16.mxu1 %v7784_v18  ;;  %3775 = vmatprep.mubr.bf16.mxu0 %v7784_v18  ;;  %v5040_v55 = vpack.c.bf16 %v4396_v30, %v4395_v42  ;;  %v4403_v30 = vld [vmem:[%s7745_s2 + $0xd0] sm:$0xff] }
 0x1e1   : > { %v2393_v43 = vsel %vm6186_vm2, %v2388_v36, %v2392_v47  ;;  %v5042_v36 = vpack.c.bf16 %v4380_v9, %v4379_v23 }
 0x1e2   : > { %v7399_v17 = vcombine.low %v2393_v43, %v2403_v37 }
 0x1e7   : > { %2216 = vmatmul.mubr.bf16.gmra.mrb[24].mxu1 %v6755_v11  ;;  %3776 = vmatmul.mubr.bf16.gmra.mrb[52].mxu0 %v6932_v51  ;;  %v3496_v11 = vrot.slane %v3495_v28, 4 }
 0x1e8   : > { %2225 = vmatprep.mubr.bf16.mxu1 %v7784_v18  ;;  %3785 = vmatprep.mubr.bf16.mxu0 %v7784_v18 }
 0x1e9   : > { %v3501_v48 = vsel %vm6186_vm2, %v3496_v11, %v3500_v14  ;;  %v5044_v14 = vpack.c.bf16 %v4398_v32, %v4397_v35  ;;  %v4383_v11 = vld [vmem:[%s7745_s2 + $0x30] sm:$0xff] }
 0x1ea   : > { %v4936_v5 = vcombine.low %v3501_v48, %v3511_v20  ;;  %v4384_v48 = vld [vmem:[%s7745_s2 + $0x38] sm:$0xff] }
 0x1eb   : > { %v5050_v20 = vpack.c.bf16 %v4384_v48, %v4383_v11 }
 0x1ef   : > { %2226 = vmatmul.mubr.bf16.gmra.mrb[28].mxu1 %v6771_v34  ;;  %3786 = vmatmul.mubr.bf16.gmra.mrb[56].mxu0 %v7399_v17 }
 0x1f0   : > { %2235 = vmatprep.mubr.bf16.mxu1 %v7784_v18  ;;  %3795 = vmatprep.mubr.bf16.mxu0 %v7784_v18 }
 0x1f7   : > { %2236 = vmatmul.mubr.bf16.gmra.mrb[32].mxu1 %v6782_v38  ;;  %3796 = vmatmul.mubr.bf16.gmra.mrb[60].mxu0 %v4936_v5 }
 0x1f8   : > { %2245 = vmatprep.mubr.bf16.mxu1 %v7784_v18  ;;  %4011 = vmatprep.mubr.bf16.mxu0 %v7784_v18 }
 0x1ff   : > { %2246 = vmatmul.mubr.bf16.gmra.mrb[36].mxu1 %v6793_v6  ;;  %4012 = vmatmul.mubr.bf16.vlgmr.msra.gmra.mrb[0].mxu0 %v6506_v19  ;;  %v3876_v19 = vrot.slane %v7389_v54, 5  ;;  %v4382_v54 = vld [vmem:[%s7745_s2 + $0x28] sm:$0xff] }
 0x200   : > { %2255 = vmatprep.mubr.bf16.mxu1 %v7784_v18  ;;  %4021 = vmatprep.mubr.bf16.mxu0 %v7784_v18  ;;  %v5046_v37 = vpack.c.bf16 %v4382_v54, %v4381_v45 }
 0x207   : > { %2256 = vmatmul.mubr.bf16.gmra.mrb[40].mxu1 %v6804_v29  ;;  %4022 = vmatmul.mubr.bf16.gmra.mrb[4].mxu0 %v6539_v62 }
 0x208   : > { %2265 = vmatprep.mubr.bf16.mxu1 %v7784_v18  ;;  %4031 = vmatprep.mubr.bf16.mxu0 %v7784_v18 }
 0x20f   : > { %2266 = vmatmul.mubr.bf16.gmra.mrb[44].mxu1 %v6843_v57  ;;  %4032 = vmatmul.mubr.bf16.gmra.mrb[8].mxu0 %v6848_v24 }
 0x210   : > { %2275 = vmatprep.mubr.bf16.mxu1 %v7784_v18  ;;  %4041 = vmatprep.mubr.bf16.mxu0 %v7784_v18 }
 0x217   : > { %2276 = vmatmul.mubr.bf16.gmra.mrb[48].mxu1 %v6885_v27  ;;  %4042 = vmatmul.mubr.bf16.gmra.mrb[12].mxu0 %v6892_v13 }
 0x218   : > { %2285 = vmatprep.mubr.bf16.mxu1 %v7784_v18  ;;  %4051 = vmatprep.mubr.bf16.mxu0 %v7784_v18 }
 0x21f   : > { %2286 = vmatmul.mubr.bf16.gmra.mrb[52].mxu1 %v6914_v44  ;;  %4052 = vmatmul.mubr.bf16.gmra.mrb[16].mxu0 %v6918_v16 }
 0x220   : > { %2295 = vmatprep.mubr.bf16.mxu1 %v7784_v18  ;;  %4061 = vmatprep.mubr.bf16.mxu0 %v7784_v18 }
 0x227   : > { %2296 = vmatmul.mubr.bf16.gmra.mrb[56].mxu1 %v6930_v40  ;;  %4062 = vmatmul.mubr.bf16.gmra.mrb[20].mxu0 %v6659_v33  ;;  %v3875_v33 = vrot.slane %v3873_v56, 4  ;;  %v4393_v40 = vld [vmem:[%s7745_s2 + $0x80] sm:$0xff] }
 0x228   : > { %2305 = vmatprep.mubr.bf16.mxu1 %v7784_v18  ;;  %4071 = vmatprep.mubr.bf16.mxu0 %v7784_v18 }
 0x22f   : > { %2306 = vmatmul.mubr.bf16.gmra.mrb[60].mxu1 %v7219_v4  ;;  %4072 = vmatmul.mubr.bf16.gmra.mrb[24].mxu0 %v6669_v61  ;;  %v4377_v4 = vld [vmem:[%s7745_s2] sm:$0xff] }
 0x230   : > { %2627 = vmatprep.mubr.bf16.mxu1 %v7784_v18  ;;  %4081 = vmatprep.mubr.bf16.mxu0 %v7784_v18 }
 0x237   : > { %2628 = vmatmul.mubr.bf16.vlgmr.msra.gmra.mrb[36].mxu1 %v6613_v39  ;;  %4082 = vmatmul.mubr.bf16.gmra.mrb[28].mxu0 %v7792_v15  ;;  %v3877_v39 = vsel %vm6419_vm5, %v3875_v33, %v3876_v19  ;;  %v4401_v33 = vld [vmem:[%s7745_s2 + $0xc0] sm:$0xff]  ;;  %v4402_v19 = vld [vmem:[%s7745_s2 + $0xc8] sm:$0xff] }
 0x238   : > { %2637 = vmatprep.mubr.bf16.mxu1 %v7784_v18  ;;  %4091 = vmatprep.mubr.bf16.mxu0 %v7784_v18 }
 0x23f   : > { %2638 = vmatmul.mubr.bf16.gmra.mrb[40].mxu1 %v6615_v7  ;;  %4092 = vmatmul.mubr.bf16.gmra.mrb[32].mxu0 %v6714_v41  ;;  %v4953_v41 = vrot.slane %v7226_v1, 9  ;;  %v4378_v1 = vld [vmem:[%s7745_s2 + $0x8] sm:$0xff] }
 0x240   : > { %2647 = vmatprep.mubr.bf16.mxu1 %v7784_v18  ;;  %4101 = vmatprep.mubr.bf16.mxu0 %v7784_v18  ;;  %v5038_v47 = vpack.c.bf16 %v4378_v1, %v4377_v4 }
 0x241   : > { %v3874_v62 = vsel %vm6419_vm5, %v4953_v41, %v3873_v56 }
 0x242   : > { %v4970_v7 = vcombine.low %v3874_v62, %v3877_v39  ;;  %v4385_v62 = vld [vmem:[%s7745_s2 + $0x40] sm:$0xff] }
 0x247   : > { %2648 = vmatmul.mubr.bf16.gmra.mrb[44].mxu1 %v6836_v8  ;;  %4102 = vmatmul.mubr.bf16.gmra.mrb[36].mxu0 %v6723_v31 }
 0x248   : > { %2657 = vmatprep.mubr.bf16.mxu1 %v7784_v18  ;;  %4111 = vmatprep.mubr.bf16.mxu0 %v7784_v18 }
 0x24f   : > { %2658 = vmatmul.mubr.bf16.gmra.mrb[48].mxu1 %v6887_v49  ;;  %4112 = vmatmul.mubr.bf16.gmra.mrb[40].mxu0 %v6748_v21 }
 0x250   : > { %2667 = vmatprep.mubr.bf16.mxu1 %v7784_v18  ;;  %4121 = vmatprep.mubr.bf16.mxu0 %v7784_v18 }
 0x257   : > { %2668 = vmatmul.mubr.bf16.gmra.mrb[52].mxu1 %v6916_v10  ;;  %4122 = vmatmul.mubr.bf16.gmra.mrb[44].mxu0 %v6761_v3 }
 0x258   : > { %2677 = vmatprep.mubr.bf16.mxu1 %v7784_v18  ;;  %4131 = vmatprep.mubr.bf16.mxu0 %v7784_v18 }
 0x25f   : > { %2678 = vmatmul.mubr.bf16.gmra.mrb[56].mxu1 %v6932_v51  ;;  %4132 = vmatmul.mubr.bf16.gmra.mrb[48].mxu0 %v6787_v63  ;;  %v4394_v51 = vld [vmem:[%s7745_s2 + $0x88] sm:$0xff] }
 0x260   : > { %2687 = vmatprep.mubr.bf16.mxu1 %v7784_v18  ;;  %4141 = vmatprep.mubr.bf16.mxu0 %v7784_v18 }
 0x267   : > { %2688 = vmatmul.mubr.bf16.gmra.mrb[60].mxu1 %v7399_v17  ;;  %4142 = vmatmul.mubr.bf16.gmra.mrb[52].mxu0 %v6820_v0  ;;  %v4400_v17 = vld [vmem:[%s7745_s2 + $0xb8] sm:$0xff] }
 0x268   : > { %4151 = vmatprep.mubr.bf16.mxu0 %v7784_v18  ;;  %v5048_v2 = vpack.c.bf16 %v4400_v17, %v4399_v52  ;;  %v4406_v52 = vld [vmem:[%s7745_s2 + $0xe8] sm:$0xff] }
 0x26f   : > { %4152 = vmatmul.mubr.bf16.gmra.mrb[56].mxu0 %v7053_v25  ;;  %v5036_v25 = vpack.c.bf16 %v4394_v51, %v4393_v40  ;;  %v4386_v40 = vld [vmem:[%s7745_s2 + $0x48] sm:$0xff] }
 0x270   : > { %4161 = vmatprep.mubr.bf16.mxu0 %v7784_v18  ;;  %v5054_v51 = vpack.c.bf16 %v4386_v40, %v4385_v62 }
 0x271   : > { %5037 = vmatprep.subr.bf16.mxu1 %v5036_v25 }
 0x272   : > { %5039 = vmatpush3.bf16.msra.mxu1 %v5038_v47 }
 0x273   : > { %5041 = vmatprep.subr.bf16.mxu1 %v5040_v55  ;;  %v4404_v55 = vld [vmem:[%s7745_s2 + $0xd8] sm:$0xff] }
 0x276   : > { %5043 = vmatpush3.bf16.msra.mxu1 %v5042_v36  ;;  %v5056_v36 = vpack.c.bf16 %v4404_v55, %v4403_v30 }
 0x277   : > { %4162 = vmatmul.mubr.bf16.gmra.mrb[60].mxu0 %v4970_v7  ;;  %5045 = vmatprep.subr.bf16.mxu1 %v5044_v14  ;;  %v5052_v7 = vpack.c.bf16 %v4402_v19, %v4401_v33 }
 0x27a   : > { %5047 = vmatpush3.bf16.msra.mxu1 %v5046_v37 }
 0x27b   : > { %5049 = vmatprep.subr.bf16.mxu1 %v5048_v2  ;;  %v4390_v2 = vld [vmem:[%s7745_s2 + $0x68] sm:$0xff] }
 0x27e   : > { %5051 = vmatpush3.bf16.msra.mxu1 %v5050_v20 }
 0x27f   : > { %5053 = vmatprep.subr.bf16.mxu1 %v5052_v7 }
 0x282   : > { %5055 = vmatpush3.bf16.msra.mxu1 %v5054_v51  ;;  %v4407_v51 = vld [vmem:[%s7745_s2 + $0xf0] sm:$0xff] }
 0x283   : > { %5057 = vmatprep.subr.bf16.mxu1 %v5056_v36 }
 0x28a   : > { %v7476_v61 = vpop.f32.mrb[0].mxu1 }
 0x28b   : > { %v7478_v31 = vpop.f32.mrb[1].mxu1 }
 0x28c   : > { %v7480_v21 = vpop.f32.mrb[2].mxu1 }
 0x28d   : > { %v7482_v3 = vpop.f32.mrb[3].mxu1 }
 0x292   : > { %v7484_v34 = vpop.f32.mrb[4].mxu1 }
 0x293   : > { %v7486_v38 = vpop.f32.mrb[5].mxu1 }
 0x294   : > { %v7488_v18 = vpop.f32.mrb[6].mxu1 }
 0x295   : > { %v7490_v63 = vpop.f32.mrb[7].mxu1 }
 0x29a   : > { %v7492_v59 = vpop.f32.mrb[8].mxu1 }
 0x29b   : > { %v7494_v6 = vpop.f32.mrb[9].mxu1 }
 0x29c   : > { %v7496_v29 = vpop.f32.mrb[10].mxu1 }
 0x29d   : > { %v7498_v0 = vpop.f32.mrb[11].mxu1 }
 0x2a2   : > { %v7500_v8 = vpop.f32.mrb[12].mxu1 }
 0x2a3   : > { %v7502_v57 = vpop.f32.mrb[13].mxu1 }
 0x2a4   : > { %v7504_v24 = vpop.f32.mrb[14].mxu1 }
 0x2a5   : > { %v7506_v27 = vpop.f32.mrb[15].mxu1 }
 0x2aa   : > { %v7508_v49 = vpop.f32.mrb[16].mxu1 }
 0x2ab   : > { %v7510_v13 = vpop.f32.mrb[17].mxu1 }
 0x2ac   : > { %v7512_v44 = vpop.f32.mrb[18].mxu1 }
 0x2ad   : > { %v7514_v10 = vpop.f32.mrb[19].mxu1 }
 0x2b2   : > { %v7516_v16 = vpop.f32.mrb[20].mxu1 }
 0x2b3   : > { %v7524_v15 = vpop.f32.mrb[21].mxu1 }
 0x2b4   : > { %v7532_v46 = vpop.f32.mrb[22].mxu1 }
 0x2b5   : > { %v7534_v60 = vpop.f32.mrb[23].mxu1 }
 0x2ba   : > { %v7542_v26 = vpop.f32.mrb[24].mxu1 }
 0x2bb   : > { %v7550_v58 = vpop.f32.mrb[25].mxu1 }
 0x2bc   : > { %v7552_v12 = vpop.f32.mrb[26].mxu1 }
 0x2bd   : > { %v7560_v53 = vpop.f32.mrb[27].mxu1 }
 0x2c2   : > { %v7568_v43 = vpop.f32.mrb[28].mxu1 }
 0x2c3   : > { %v7570_v28 = vpop.f32.mrb[29].mxu1 }
 0x2c4   : > { %v7572_v50 = vpop.f32.mrb[30].mxu1 }
 0x2c5   : > { %v7583_v22 = vpop.f32.mrb[31].mxu1 }
 0x2ca   : > { %v7588_v5 = vpop.f32.mrb[32].mxu1 }
 0x2cb   : > { %v7590_v56 = vpop.f32.mrb[33].mxu1 }
 0x2cc   : > { %v7592_v41 = vpop.f32.mrb[34].mxu1 }
 0x2cd   : > { %v7603_v39 = vpop.f32.mrb[35].mxu1 }
 0x2d2   : > { %v4013_v25 = vpop.f32.mrb[0].mxu0 }
 0x2d3   : > { %v5087_v4 = vadd.f32 %v4013_v25, %v7476_v61  ;;  %v4015_v1 = vpop.f32.mrb[1].mxu0  ;;  %v4387_v61 = vld [vmem:[%s7745_s2 + $0x50] sm:$0xff]  ;;  %v4408_v25 = vld [vmem:[%s7745_s2 + $0xf8] sm:$0xff] }
 0x2d4   : > { %v5088_v47 = vadd.f32 %v4015_v1, %v7478_v31  ;;  %v4017_v42 = vpop.f32.mrb[2].mxu0  ;;  %v4388_v31 = vld [vmem:[%s7745_s2 + $0x58] sm:$0xff] }
 0x2d5   : > { %v5089_v23 = vadd.f32 %v4017_v42, %v7480_v21  ;;  %v4019_v9 = vpop.f32.mrb[3].mxu0  ;;  %v5058_v32 = vpack.c.bf16 %v4388_v31, %v4387_v61  ;;  %v4236_v14 = vmax.f32 %v5087_v4, 0.0  ;;  %v4405_v21 = vld [vmem:[%s7745_s2 + $0xe0] sm:$0xff]  ;;  %v5064_v42 = vpack.c.bf16 %v4408_v25, %v4407_v51 }
 0x2d6   : > { %v5090_v35 = vadd.f32 %v4019_v9, %v7482_v3  ;;  %v4237_v54 = vmax.f32 %v5088_v47, 0.0  ;;  %v5060_v11 = vpack.c.bf16 %v4406_v52, %v4405_v21  ;;  %v4389_v3 = vld [vmem:[%s7745_s2 + $0x60] sm:$0xff] }
 0x2d7   : > { %v4238_v45 = vmax.f32 %v5089_v23, 0.0  ;;  %5059 = vmatpush3.bf16.msra.mxu1 %v5058_v32  ;;  %v5062_v33 = vpack.c.bf16 %v4390_v2, %v4389_v3 }
 0x2d8   : > { %v4239_v37 = vmax.f32 %v5090_v35, 0.0  ;;  %5061 = vmatprep.subr.bf16.mxu1 %v5060_v11 }
 0x2d9   : > { %v4300_v17 = vadd.f32 %v4238_v45, %v4236_v14 }
 0x2da   : > { %v4337_v48 = vadd.f32 %v4239_v37, %v4237_v54  ;;  %v4023_v20 = vpop.f32.mrb[4].mxu0 }
 0x2db   : > { %v5091_v19 = vadd.f32 %v4023_v20, %v7484_v34  ;;  %v4025_v62 = vpop.f32.mrb[5].mxu0  ;;  %5063 = vmatpush3.bf16.msra.mxu1 %v5062_v33  ;;  %v4391_v34 = vld [vmem:[%s7745_s2 + $0x70] sm:$0xff] }
 0x2dc   : > { %v5092_v7 = vadd.f32 %v4025_v62, %v7486_v38  ;;  %v4027_v40 = vpop.f32.mrb[6].mxu0  ;;  %v4392_v38 = vld [vmem:[%s7745_s2 + $0x78] sm:$0xff]  ;;  %5065 = vmatprep.subr.bf16.mxu1 %v5064_v42 }
 0x2dd   : > { %v4240_v4 = vmax.f32 %v5091_v19, 0.0  ;;  %v5093_v1 = vadd.f32 %v4027_v40, %v7488_v18  ;;  %v4029_v47 = vpop.f32.mrb[7].mxu0  ;;  %v5066_v23 = vpack.c.bf16 %v4392_v38, %v4391_v34 }
 0x2de   : > { %v4241_v30 = vmax.f32 %v5092_v7, 0.0  ;;  %v5094_v55 = vadd.f32 %v4029_v47, %v7490_v63 }
 0x2df   : > { %v4301_v9 = vadd.f32 %v4300_v17, %v4240_v4  ;;  %v4242_v36 = vmax.f32 %v5093_v1, 0.0  ;;  %5067 = vmatpush3.bf16.msra.mxu1 %v5066_v23 }
 0x2e0   : > { %v4338_v61 = vadd.f32 %v4337_v48, %v4241_v30  ;;  %v4243_v31 = vmax.f32 %v5094_v55, 0.0 }
 0x2e1   : > { %v4302_v18 = vadd.f32 %v4301_v9, %v4242_v36 }
 0x2e2   : > { %v4339_v35 = vadd.f32 %v4338_v61, %v4243_v31  ;;  %v4033_v32 = vpop.f32.mrb[8].mxu0 }
 0x2e3   : > { %v5095_v14 = vadd.f32 %v4033_v32, %v7492_v59  ;;  %v4035_v45 = vpop.f32.mrb[9].mxu0 }
 0x2e4   : > { %v5096_v54 = vadd.f32 %v4035_v45, %v7494_v6  ;;  %v4037_v37 = vpop.f32.mrb[10].mxu0 }
 0x2e5   : > { %v4244_v21 = vmax.f32 %v5095_v14, 0.0  ;;  %v5097_v52 = vadd.f32 %v4037_v37, %v7496_v29  ;;  %v4039_v63 = vpop.f32.mrb[11].mxu0 }
 0x2e6   : > { %v4245_v11 = vmax.f32 %v5096_v54, 0.0  ;;  %v5098_v17 = vadd.f32 %v4039_v63, %v7498_v0 }
 0x2e7   : > { %v4303_v3 = vadd.f32 %v4302_v18, %v4244_v21  ;;  %v4246_v2 = vmax.f32 %v5097_v52, 0.0 }
 0x2e8   : > { %v4340_v48 = vadd.f32 %v4339_v35, %v4245_v11  ;;  %v4247_v20 = vmax.f32 %v5098_v17, 0.0 }
 0x2e9   : > { %v4304_v33 = vadd.f32 %v4303_v3, %v4246_v2 }
 0x2ea   : > { %v4341_v19 = vadd.f32 %v4340_v48, %v4247_v20  ;;  %v4043_v62 = vpop.f32.mrb[12].mxu0 }
 0x2eb   : > { %v5099_v59 = vadd.f32 %v4043_v62, %v7500_v8  ;;  %v4045_v7 = vpop.f32.mrb[13].mxu0 }
 0x2ec   : > { %v5100_v6 = vadd.f32 %v4045_v7, %v7502_v57  ;;  %v4047_v40 = vpop.f32.mrb[14].mxu0 }
 0x2ed   : > { %v4248_v51 = vmax.f32 %v5099_v59, 0.0  ;;  %v5101_v29 = vadd.f32 %v4047_v40, %v7504_v24  ;;  %v4049_v25 = vpop.f32.mrb[15].mxu0 }
 0x2ee   : > { %v4249_v4 = vmax.f32 %v5100_v6, 0.0  ;;  %v5102_v0 = vadd.f32 %v4049_v25, %v7506_v27 }
 0x2ef   : > { %v4305_v1 = vadd.f32 %v4304_v33, %v4248_v51  ;;  %v4250_v47 = vmax.f32 %v5101_v29, 0.0 }
 0x2f0   : > { %v4342_v42 = vadd.f32 %v4341_v19, %v4249_v4  ;;  %v4251_v34 = vmax.f32 %v5102_v0, 0.0 }
 0x2f1   : > { %v4306_v38 = vadd.f32 %v4305_v1, %v4250_v47 }
 0x2f2   : > { %v4343_v30 = vadd.f32 %v4342_v42, %v4251_v34  ;;  %v4053_v55 = vpop.f32.mrb[16].mxu0 }
 0x2f3   : > { %v5103_v8 = vadd.f32 %v4053_v55, %v7508_v49  ;;  %v4055_v23 = vpop.f32.mrb[17].mxu0 }
 0x2f4   : > { %v5104_v57 = vadd.f32 %v4055_v23, %v7510_v13  ;;  %v4057_v9 = vpop.f32.mrb[18].mxu0 }
 0x2f5   : > { %v4252_v36 = vmax.f32 %v5103_v8, 0.0  ;;  %v5105_v24 = vadd.f32 %v4057_v9, %v7512_v44  ;;  %v4059_v61 = vpop.f32.mrb[19].mxu0 }
 0x2f6   : > { %v4253_v31 = vmax.f32 %v5104_v57, 0.0  ;;  %v5106_v27 = vadd.f32 %v4059_v61, %v7514_v10 }
 0x2f7   : > { %v4307_v18 = vadd.f32 %v4306_v38, %v4252_v36  ;;  %v4254_v35 = vmax.f32 %v5105_v24, 0.0 }
 0x2f8   : > { %v4344_v32 = vadd.f32 %v4343_v30, %v4253_v31  ;;  %v4255_v14 = vmax.f32 %v5106_v27, 0.0 }
 0x2f9   : > { %v4308_v45 = vadd.f32 %v4307_v18, %v4254_v35 }
 0x2fa   : > { %v4345_v54 = vadd.f32 %v4344_v32, %v4255_v14  ;;  %v4063_v37 = vpop.f32.mrb[20].mxu0 }
 0x2fb   : > { %v5107_v49 = vadd.f32 %v4063_v37, %v7516_v16  ;;  %v4065_v21 = vpop.f32.mrb[21].mxu0 }
 0x2fc   : > { %v5108_v13 = vadd.f32 %v4065_v21, %v7524_v15  ;;  %v4067_v52 = vpop.f32.mrb[22].mxu0 }
 0x2fd   : > { %v4256_v63 = vmax.f32 %v5107_v49, 0.0  ;;  %v5109_v44 = vadd.f32 %v4067_v52, %v7532_v46  ;;  %v4069_v11 = vpop.f32.mrb[23].mxu0 }
 0x2fe   : > { %v4257_v17 = vmax.f32 %v5108_v13, 0.0  ;;  %v5110_v10 = vadd.f32 %v4069_v11, %v7534_v60 }
 0x2ff   : > { %v4309_v3 = vadd.f32 %v4308_v45, %v4256_v63  ;;  %v4258_v2 = vmax.f32 %v5109_v44, 0.0 }
 0x300   : > { %v4346_v48 = vadd.f32 %v4345_v54, %v4257_v17  ;;  %v4259_v20 = vmax.f32 %v5110_v10, 0.0 }
 0x301   : > { %v4310_v33 = vadd.f32 %v4309_v3, %v4258_v2 }
 0x302   : > { %v4347_v19 = vadd.f32 %v4346_v48, %v4259_v20  ;;  %v4073_v62 = vpop.f32.mrb[24].mxu0 }
 0x303   : > { %v5111_v16 = vadd.f32 %v4073_v62, %v7542_v26  ;;  %v4075_v59 = vpop.f32.mrb[25].mxu0 }
 0x304   : > { %v5112_v15 = vadd.f32 %v4075_v59, %v7550_v58  ;;  %v4077_v7 = vpop.f32.mrb[26].mxu0 }
 0x305   : > { %v4260_v6 = vmax.f32 %v5111_v16, 0.0  ;;  %v5113_v46 = vadd.f32 %v4077_v7, %v7552_v12  ;;  %v4079_v40 = vpop.f32.mrb[27].mxu0 }
 0x306   : > { %v4261_v51 = vmax.f32 %v5112_v15, 0.0  ;;  %v5114_v60 = vadd.f32 %v4079_v40, %v7560_v53 }
 0x307   : > { %v4311_v29 = vadd.f32 %v4310_v33, %v4260_v6  ;;  %v4262_v25 = vmax.f32 %v5113_v46, 0.0 }
 0x308   : > { %v4348_v4 = vadd.f32 %v4347_v19, %v4261_v51  ;;  %v4263_v0 = vmax.f32 %v5114_v60, 0.0 }
 0x309   : > { %v4312_v47 = vadd.f32 %v4311_v29, %v4262_v25 }
 0x30a   : > { %v2629_v1 = vpop.f32.mrb[36].mxu1  ;;  %v4349_v34 = vadd.f32 %v4348_v4, %v4263_v0  ;;  %v4083_v26 = vpop.f32.mrb[28].mxu0 }
 0x30b   : > { %v2631_v42 = vpop.f32.mrb[37].mxu1  ;;  %v5115_v58 = vadd.f32 %v4083_v26, %v7568_v43  ;;  %v4085_v30 = vpop.f32.mrb[29].mxu0 }
 0x30c   : > { %v2633_v38 = vpop.f32.mrb[38].mxu1  ;;  %v5116_v12 = vadd.f32 %v4085_v30, %v7570_v28  ;;  %v4087_v8 = vpop.f32.mrb[30].mxu0 }
 0x30d   : > { %v2635_v55 = vpop.f32.mrb[39].mxu1  ;;  %v4264_v23 = vmax.f32 %v5115_v58, 0.0  ;;  %v5117_v53 = vadd.f32 %v4087_v8, %v7572_v50  ;;  %v4089_v57 = vpop.f32.mrb[31].mxu0 }
 0x30e   : > { %v4265_v9 = vmax.f32 %v5116_v12, 0.0  ;;  %v5118_v36 = vadd.f32 %v4089_v57, %v7583_v22 }
 0x30f   : > { %v4313_v24 = vadd.f32 %v4312_v47, %v4264_v23  ;;  %v4266_v61 = vmax.f32 %v5117_v53, 0.0 }
 0x310   : > { %v4350_v31 = vadd.f32 %v4349_v34, %v4265_v9  ;;  %v4267_v27 = vmax.f32 %v5118_v36, 0.0 }
 0x311   : > { %v4314_v35 = vadd.f32 %v4313_v24, %v4266_v61 }
 0x312   : > { %v2639_v18 = vpop.f32.mrb[40].mxu1  ;;  %v4351_v43 = vadd.f32 %v4350_v31, %v4267_v27  ;;  %v4093_v14 = vpop.f32.mrb[32].mxu0 }
 0x313   : > { %v2641_v32 = vpop.f32.mrb[41].mxu1  ;;  %v5119_v28 = vadd.f32 %v4093_v14, %v7588_v5  ;;  %v4095_v54 = vpop.f32.mrb[33].mxu0 }
 0x314   : > { %v2643_v45 = vpop.f32.mrb[42].mxu1  ;;  %v5120_v50 = vadd.f32 %v4095_v54, %v7590_v56  ;;  %v4097_v49 = vpop.f32.mrb[34].mxu0 }
 0x315   : > { %v2645_v37 = vpop.f32.mrb[43].mxu1  ;;  %v4268_v21 = vmax.f32 %v5119_v28, 0.0  ;;  %v5121_v22 = vadd.f32 %v4097_v49, %v7592_v41  ;;  %v4099_v13 = vpop.f32.mrb[35].mxu0 }
 0x316   : > { %v4269_v52 = vmax.f32 %v5120_v50, 0.0  ;;  %v5122_v63 = vadd.f32 %v4099_v13, %v7603_v39 }
 0x317   : > { %v4315_v44 = vadd.f32 %v4314_v35, %v4268_v21  ;;  %v4270_v11 = vmax.f32 %v5121_v22, 0.0 }
 0x318   : > { %v4352_v17 = vadd.f32 %v4351_v43, %v4269_v52  ;;  %v4271_v10 = vmax.f32 %v5122_v63, 0.0 }
 0x319   : > { %v4316_v2 = vadd.f32 %v4315_v44, %v4270_v11 }
 0x31a   : > { %v2649_v3 = vpop.f32.mrb[44].mxu1  ;;  %v4353_v5 = vadd.f32 %v4352_v17, %v4271_v10  ;;  %v4103_v20 = vpop.f32.mrb[36].mxu0 }
 0x31b   : > { %v2651_v48 = vpop.f32.mrb[45].mxu1  ;;  %v5123_v19 = vadd.f32 %v4103_v20, %v2629_v1  ;;  %v4105_v56 = vpop.f32.mrb[37].mxu0 }
 0x31c   : > { %v2653_v33 = vpop.f32.mrb[46].mxu1  ;;  %v5124_v16 = vadd.f32 %v4105_v56, %v2631_v42  ;;  %v4107_v59 = vpop.f32.mrb[38].mxu0 }
 0x31d   : > { %v2655_v62 = vpop.f32.mrb[47].mxu1  ;;  %v4272_v41 = vmax.f32 %v5123_v19, 0.0  ;;  %v5125_v15 = vadd.f32 %v4107_v59, %v2633_v38  ;;  %v4109_v7 = vpop.f32.mrb[39].mxu0 }
 0x31e   : > { %v4273_v6 = vmax.f32 %v5124_v16, 0.0  ;;  %v5126_v39 = vadd.f32 %v4109_v7, %v2635_v55 }
 0x31f   : > { %v4317_v46 = vadd.f32 %v4316_v2, %v4272_v41  ;;  %v4274_v40 = vmax.f32 %v5125_v15, 0.0 }
 0x320   : > { %v4354_v51 = vadd.f32 %v4353_v5, %v4273_v6  ;;  %v4275_v60 = vmax.f32 %v5126_v39, 0.0 }
 0x321   : > { %v4318_v25 = vadd.f32 %v4317_v46, %v4274_v40 }
 0x322   : > { %v2659_v29 = vpop.f32.mrb[48].mxu1  ;;  %v4355_v0 = vadd.f32 %v4354_v51, %v4275_v60  ;;  %v4113_v47 = vpop.f32.mrb[40].mxu0 }
 0x323   : > { %v2661_v4 = vpop.f32.mrb[49].mxu1  ;;  %v5127_v1 = vadd.f32 %v4113_v47, %v2639_v18  ;;  %v4115_v26 = vpop.f32.mrb[41].mxu0 }
 0x324   : > { %v2663_v34 = vpop.f32.mrb[50].mxu1  ;;  %v5128_v42 = vadd.f32 %v4115_v26, %v2641_v32  ;;  %v4117_v30 = vpop.f32.mrb[42].mxu0 }
 0x325   : > { %v2665_v58 = vpop.f32.mrb[51].mxu1  ;;  %v4276_v12 = vmax.f32 %v5127_v1, 0.0  ;;  %v5129_v38 = vadd.f32 %v4117_v30, %v2643_v45  ;;  %v4119_v8 = vpop.f32.mrb[43].mxu0 }
 0x326   : > { %v4277_v23 = vmax.f32 %v5128_v42, 0.0  ;;  %v5130_v55 = vadd.f32 %v4119_v8, %v2645_v37 }
 0x327   : > { %v4319_v53 = vadd.f32 %v4318_v25, %v4276_v12  ;;  %v4278_v57 = vmax.f32 %v5129_v38, 0.0 }
 0x328   : > { %v4356_v9 = vadd.f32 %v4355_v0, %v4277_v23  ;;  %v4279_v36 = vmax.f32 %v5130_v55, 0.0 }
 0x329   : > { %v4320_v61 = vadd.f32 %v4319_v53, %v4278_v57 }
 0x32a   : > { %v2669_v24 = vpop.f32.mrb[52].mxu1  ;;  %v4357_v27 = vadd.f32 %v4356_v9, %v4279_v36  ;;  %v4123_v35 = vpop.f32.mrb[44].mxu0 }
 0x32b   : > { %v2671_v31 = vpop.f32.mrb[53].mxu1  ;;  %v5131_v18 = vadd.f32 %v4123_v35, %v2649_v3  ;;  %v4125_v14 = vpop.f32.mrb[45].mxu0 }
 0x32c   : > { %v2673_v43 = vpop.f32.mrb[54].mxu1  ;;  %v5132_v32 = vadd.f32 %v4125_v14, %v2651_v48  ;;  %v4127_v54 = vpop.f32.mrb[46].mxu0 }
 0x32d   : > { %v2675_v28 = vpop.f32.mrb[55].mxu1  ;;  %v4280_v50 = vmax.f32 %v5131_v18, 0.0  ;;  %v5133_v45 = vadd.f32 %v4127_v54, %v2653_v33  ;;  %v4129_v49 = vpop.f32.mrb[47].mxu0 }
 0x32e   : > { %v4281_v21 = vmax.f32 %v5132_v32, 0.0  ;;  %v5134_v37 = vadd.f32 %v4129_v49, %v2655_v62 }
 0x32f   : > { %v4321_v22 = vadd.f32 %v4320_v61, %v4280_v50  ;;  %v4282_v13 = vmax.f32 %v5133_v45, 0.0 }
 0x330   : > { %v4358_v52 = vadd.f32 %v4357_v27, %v4281_v21  ;;  %v4283_v63 = vmax.f32 %v5134_v37, 0.0 }
 0x331   : > { %v4322_v11 = vadd.f32 %v4321_v22, %v4282_v13 }
 0x332   : > { %v2679_v44 = vpop.f32.mrb[56].mxu1  ;;  %v4359_v10 = vadd.f32 %v4358_v52, %v4283_v63  ;;  %v4133_v2 = vpop.f32.mrb[48].mxu0 }
 0x333   : > { %v2681_v17 = vpop.f32.mrb[57].mxu1  ;;  %v5135_v3 = vadd.f32 %v4133_v2, %v2659_v29  ;;  %v4135_v20 = vpop.f32.mrb[49].mxu0 }
 0x334   : > { %v2683_v5 = vpop.f32.mrb[58].mxu1  ;;  %v5136_v48 = vadd.f32 %v4135_v20, %v2661_v4  ;;  %v4137_v56 = vpop.f32.mrb[50].mxu0 }
 0x335   : > { %v2685_v19 = vpop.f32.mrb[59].mxu1  ;;  %v4284_v16 = vmax.f32 %v5135_v3, 0.0  ;;  %v5137_v33 = vadd.f32 %v4137_v56, %v2663_v34  ;;  %v4139_v59 = vpop.f32.mrb[51].mxu0 }
 0x336   : > { %v4285_v41 = vmax.f32 %v5136_v48, 0.0  ;;  %v5138_v62 = vadd.f32 %v4139_v59, %v2665_v58 }
 0x337   : > { %v4323_v15 = vadd.f32 %v4322_v11, %v4284_v16  ;;  %v4286_v7 = vmax.f32 %v5137_v33, 0.0 }
 0x338   : > { %v4360_v6 = vadd.f32 %v4359_v10, %v4285_v41  ;;  %v4287_v39 = vmax.f32 %v5138_v62, 0.0 }
 0x339   : > { %v4324_v40 = vadd.f32 %v4323_v15, %v4286_v7 }
 0x33a   : > { %v2689_v46 = vpop.f32.mrb[60].mxu1  ;;  %v4361_v60 = vadd.f32 %v4360_v6, %v4287_v39  ;;  %v4143_v25 = vpop.f32.mrb[52].mxu0 }
 0x33b   : > { %v2691_v51 = vpop.f32.mrb[61].mxu1  ;;  %v5139_v29 = vadd.f32 %v4143_v25, %v2669_v24  ;;  %v4145_v47 = vpop.f32.mrb[53].mxu0  ;;  %v4480_v25 = vld [vmem:[%s7747_s4] sm:$0xff] }
 0x33c   : > { %v2693_v0 = vpop.f32.mrb[62].mxu1  ;;  %v5140_v4 = vadd.f32 %v4145_v47, %v2671_v31  ;;  %v4147_v26 = vpop.f32.mrb[54].mxu0  ;;  %v5967_v47 = vmov 0.0|0.0  }
 0x33d   : > { %v2695_v1 = vpop.f32.mrb[63].mxu1  ;;  %v4288_v42 = vmax.f32 %v5139_v29, 0.0  ;;  %v5141_v34 = vadd.f32 %v4147_v26, %v2673_v43  ;;  %v4149_v30 = vpop.f32.mrb[55].mxu0  ;;  %5068 = vmatprep.subr.bf16.mxu1 %v5967_v47  ;;  %v4409_v26 = vld [vmem:[%s7746_s3] sm:$0x1] }
 0x33e   : > { %v4289_v12 = vmax.f32 %v5140_v4, 0.0  ;;  %v5142_v58 = vadd.f32 %v4149_v30, %v2675_v28 }
 0x33f   : > { %v4325_v38 = vadd.f32 %v4324_v40, %v4288_v42  ;;  %v4290_v8 = vmax.f32 %v5141_v34, 0.0 }
 0x340   : > { %v4362_v23 = vadd.f32 %v4361_v60, %v4289_v12  ;;  %v4291_v55 = vmax.f32 %v5142_v58, 0.0  ;;  %v4482_v12 = vld [vmem:[%s7748_s5] sm:$0x1] }
 0x341   : > { %v4326_v53 = vadd.f32 %v4325_v38, %v4290_v8  ;;  %v4557_v38 = vld [vmem:[%s289_s15] sm:$0x1] }
 0x342   : > { %v4363_v57 = vadd.f32 %v4362_v23, %v4291_v55  ;;  %v4153_v9 = vpop.f32.mrb[56].mxu0 }
 0x343   : > { %v5143_v36 = vadd.f32 %v4153_v9, %v2679_v44  ;;  %v4155_v61 = vpop.f32.mrb[57].mxu0 }
 0x344   : > { %v5144_v27 = vadd.f32 %v4155_v61, %v2681_v17  ;;  %v4157_v24 = vpop.f32.mrb[58].mxu0 }
 0x345   : > { %v4292_v35 = vmax.f32 %v5143_v36, 0.0  ;;  %v5145_v18 = vadd.f32 %v4157_v24, %v2683_v5  ;;  %v4159_v31 = vpop.f32.mrb[59].mxu0 }
 0x346   : > { %v4293_v14 = vmax.f32 %v5144_v27, 0.0  ;;  %v5146_v32 = vadd.f32 %v4159_v31, %v2685_v19 }
 0x347   : > { %v4327_v43 = vadd.f32 %v4326_v53, %v4292_v35  ;;  %v4294_v54 = vmax.f32 %v5145_v18, 0.0 }
 0x348   : > { %v4364_v50 = vadd.f32 %v4363_v57, %v4293_v14  ;;  %v4295_v28 = vmax.f32 %v5146_v32, 0.0 }
 0x349   : > { %v4328_v45 = vadd.f32 %v4327_v43, %v4294_v54 }
 0x34a   : > { %v4365_v49 = vadd.f32 %v4364_v50, %v4295_v28  ;;  %v4163_v21 = vpop.f32.mrb[60].mxu0 }
 0x34b   : > { %v5147_v37 = vadd.f32 %v4163_v21, %v2689_v46  ;;  %v4165_v22 = vpop.f32.mrb[61].mxu0 }
 0x34c   : > { %v5148_v13 = vadd.f32 %v4165_v22, %v2691_v51  ;;  %v4167_v52 = vpop.f32.mrb[62].mxu0 }
 0x34d   : > { %v4296_v63 = vmax.f32 %v5147_v37, 0.0  ;;  %v5149_v44 = vadd.f32 %v4167_v52, %v2693_v0  ;;  %v4169_v11 = vpop.f32.mrb[63].mxu0  ;;  %v4481_v0 = vld [vmem:[%s7747_s4 + $0x8] sm:$0xff] }
 0x34e   : > { %v4297_v17 = vmax.f32 %v5148_v13, 0.0  ;;  %v5150_v10 = vadd.f32 %v4169_v11, %v2695_v1  ;;  %v5069_v29 = vpack.c.bf16 %v4481_v0, %v4480_v25  ;;  %v5969_v1 = vmov 0.0  }
 0x34f   : > { %v4329_v2 = vadd.f32 %v4328_v45, %v4296_v63  ;;  %v4298_v5 = vmax.f32 %v5149_v44, 0.0 }
 0x350   : > { %v4366_v3 = vadd.f32 %v4365_v49, %v4297_v17  ;;  %v4299_v20 = vmax.f32 %v5150_v10, 0.0 }
 0x351   : > { %v4330_v19 = vadd.f32 %v4329_v2, %v4298_v5 }
 0x352   : > { %v4367_v48 = vadd.f32 %v4366_v3, %v4299_v20 }
 0x353   : > { %v4331_v56 = vrot.slane %v4330_v19, 4 }
 0x354   : > { %v4368_v16 = vrot.slane %v4367_v48, 4 }
 0x355   : > { %v4332_v33 = vadd.f32 %v4331_v56, %v4330_v19 }
 0x356   : > { %v4369_v59 = vadd.f32 %v4368_v16, %v4367_v48 }
 0x357   : > { %v4333_v41 = vrot.slane %v4332_v33, 2 }
 0x358   : > { %v4370_v62 = vrot.slane %v4369_v59, 2 }
 0x359   : > { %v4334_v15 = vadd.f32 %v4333_v41, %v4332_v33 }
 0x35a   : > { %v4371_v7 = vadd.f32 %v4370_v62, %v4369_v59 }
 0x35b   : > { %v4335_v6 = vrot.slane %v4334_v15, 1 }
 0x35c   : > { %v4372_v39 = vrot.slane %v4371_v7, 1 }
 0x35d   : > { %v4336_v46 = vadd.f32 %v4335_v6, %v4334_v15 }
 0x35e   : > { %v4373_v40 = vadd.f32 %v4372_v39, %v4371_v7 }
 0x35f   : > { %v4375_v60 = vmul.f32 0.00390625, %v4336_v46 }
 0x360   : > { %v4376_v51 = vmul.f32 0.00390625, %v4373_v40 }
 0x362   : > { %4474 = vmatprep.mubr.f32.mxu1 %v4376_v51 }
 0x363   : > { %4475 = vmatmul.mubr.f32.vlgmr.msra.gmra.mrb[64].mxu1 %v4375_v60 }
 0x364   : > { %5070 = vmatpush3.bf16.msra.mxu1 %v5069_v29  ;;  %5033 = vmatprep.mubr.msk.f32.mxu1 %vm5968_vm6, %v5969_v1 }
 0x436   : > { %v5023_v4 = vpop.f32.mrb[64].mxu1 }
 0x437   : > { %v5024_v42 = vpop.f32.mrb[65].mxu1 }
 0x438   : > { %v5025_v34 = vadd.f32 %v5024_v42, %v5023_v4 }
 0x43a   : > { %v4477_v30 = vadd.f32 %v5025_v34, %v4409_v26 }
 0x43c   : > { %5034 = vmatmul.mubr.msk.f32.vlgmr.msra.gmra.mrb[66].mxu1 %vm4483_vm7, %v4477_v30 }
 0x50f   : > { %v4553_v58 = vpop.f32.mrb[66].mxu1 }
 0x510   : > { %v4554_v8 = vadd.f32 %v4553_v58, %v4482_v12  ;;  %v5035_v23 = vpop.f32.mrb[67].mxu1 }
 0x512   : > { %v4558_v55 = vmul.f32 %v4557_v38, %v4554_v8 }
 0x514   : > { %4560 = vst.msk [vmem:[%s281_s19] sm:$0x1] %vm4559_vm8, %v4558_v55 }
 0x515   : > { %5915 = shalt.err (!%p5912_p3)
}
 0x516   : > { %s5916_s9 = scalar_lea.hbm %s7701_s29, 16  ;;  %s5920_s17 = scalar_lea.hbm %s7750_s7, 32 }
 0x517   : > { %p5917_p4 = scmp.ne.s32.totalorder %s7701_s29, %s5916_s9  ;;  %p5921_p9 = scmp.lt.u32.totalorder %s7701_s29, %s7750_s7 }
 0x518   : > { %p5922_p10 = scmp.lt.u32.totalorder %s5920_s17, %s5916_s9  ;;  %p5924_p12 = scmp.lt.u32.totalorder %s5916_s9, %s7701_s29 }
 0x519   : > { %p5918_p7 = pnand %p5917_p4, %p6049_p5 }
 0x51a   : > { %p5923_p11 = por %p5922_p10, %p5921_p9 }
 0x51b   : > { %p5919_p8 = pneg %p5918_p7 }
 0x51c   : > { %p5925_p13 = por %p5924_p12, %p5923_p11 }
 0x51e   : > { %p5926_p0 = pnand %p5925_p13, %p5919_p8 }
 0x520   : > { %5929 = shalt.err (!%p5926_p0)
}
 0x521   : > { %5600 = dma.vmem_to_hbm [thread:$0]  (%p6049_p5), %s7703_s20, 16, %s7701_s29, %s4562_s13  }
 0x522 PF: > { %p5606_p1 = scmp.ge.s32.totalorder %s5964_s27, 2  ;;  %s4586_s21 = sand.u32 1, %s5952_s24  }
 0x523   : > { %s4587_s23 = scalar_lea.sflag [#allocation3], %s4586_s21 }
 0x524   : > { %p5603_p2 = pnand %p5606_p1, %p6053_p6 }
 0x526   : > { %5947 = dma.done.wait (!%p5603_p2), %s4587_s23, 16  }
 0x527   : > { %5949 = vsyncadd (!%p5603_p2), %s4587_s23, 4294967280  ;;  %p17_p3 = scmp.ge.s32.totalorder %s6036_s30, 4   ;;  %s7804_s24 = smov %s5956_s25 }
 0x528   : > { %s7805_s25 = smov %s5960_s26  ;;  %s7806_s26 = smov %s6047_s10 }
 0x529   : > { %s7807_s27 = smov %s6036_s30  ;;  %19 = sbr.rel (!%p17_p3) target bundleno = 3 (0x3), region = 94 }
 0x530   :  { %4591 = vsyncpa [#allocation3], 1 }
 0x531   :  { %4593 = vsyncpa [#allocation3 + $0x1], 1 }

</bundles_post_ra>
